<compile_context>
chip_gen: v6e
topology: v6e:2x2x1
jax: 0.10.0
libtpu: 0.0.40
codegen_flags: <defaults>
</compile_context>

<pallas_src>
import math
import functools

import jax
import jax.numpy as jnp
from jax import lax
from jax.experimental import pallas as pl
from jax.experimental.pallas import tpu as pltpu


def _essattn_kernel(x_ref, wqkv_ref, bqkv_ref, wln_ref, bln_ref, o_ref,
                    kv_ref, ss_ref, a_bf_ref, *stash_refs,
                    N, C, tn, use_stash):
    """grid = (batch, phase, n_tile); weight columns are ordered [q, v, k]."""
    phase = pl.program_id(1)
    tile = pl.program_id(2)
    inv_sqrt_n = 1.0 / math.sqrt(N)
    if use_stash:
        q2n_stash, v_stash = stash_refs

    @pl.when(phase == 0)
    def _accumulate():
        @pl.when(tile == 0)
        def _init():
            kv_ref[...] = jnp.zeros_like(kv_ref)
            ss_ref[...] = jnp.zeros_like(ss_ref)

        x = x_ref[0]  # (tn, C) bf16
        if use_stash:
            # Full 3C projection once (q/v are stashed for phase 1).
            proj = (jnp.dot(x, wqkv_ref[...], preferred_element_type=jnp.float32)
                    + bqkv_ref[...])
            q = proj[:, :C]
            v = proj[:, C:2 * C]
            k = proj[:, 2 * C:]
        else:
            # Only the contiguous [v, k] slab (columns C:3C) is needed here.
            proj = (jnp.dot(x, wqkv_ref[:, C:], preferred_element_type=jnp.float32)
                    + bqkv_ref[:, C:])
            v = proj[:, :C]
            k = proj[:, C:]

        k = k - jnp.mean(k, axis=1, keepdims=True)
        k2 = k * k
        k2s = jnp.sum(k2, axis=1, keepdims=True)
        # k2 / (k2s + 1e-7) via EUP approximate reciprocal.
        k2t = k2 * pl.reciprocal(k2s + 1e-7, approx=True)

        # S += per-channel sum of squares of k2tilde (for the column L2 norm).
        ss_ref[...] += jnp.sum(k2t * k2t, axis=0, keepdims=True)
        # A += k2t^T @ v : contract the token axis directly on the MXU,
        # no materialized transpose.
        kv_ref[...] += lax.dot_general(
            k2t.astype(jnp.bfloat16), v.astype(jnp.bfloat16),
            dimension_numbers=(((0,), (0,)), ((), ())),
            preferred_element_type=jnp.float32)

        if use_stash:
            q = q - jnp.mean(q, axis=1, keepdims=True)
            q2 = q * q
            q2s = jnp.sum(q2, axis=1, keepdims=True)
            q2t = q2 * pl.reciprocal(q2s + 1e-7, approx=True)
            row_nrm2 = jnp.sum(q2t * q2t, axis=1, keepdims=True)
            q2n = q2t * lax.rsqrt(jnp.maximum(row_nrm2, 1e-24))
            row0 = pl.multiple_of(tile * tn, tn)
            q2n_stash[pl.ds(row0, tn), :] = q2n.astype(jnp.bfloat16)
            v_stash[pl.ds(row0, tn), :] = v.astype(jnp.bfloat16)

    @pl.when(phase == 1)
    def _emit():
        @pl.when(tile == 0)
        def _finalize_globals():
            # Hoisted out of the per-tile loop: bf16 copy of A, and the
            # combined column scale rsqrt(max(S, eps^2)) / sqrt(N)
            # (overwrites ss_ref in place; it is re-zeroed next batch).
            a_bf_ref[...] = kv_ref[...].astype(jnp.bfloat16)
            ss_ref[...] = lax.rsqrt(jnp.maximum(ss_ref[...], 1e-24)) * inv_sqrt_n

        if use_stash:
            row0 = pl.multiple_of(tile * tn, tn)
            q2n = q2n_stash[pl.ds(row0, tn), :].astype(jnp.float32)
            v = v_stash[pl.ds(row0, tn), :].astype(jnp.float32)
        else:
            x = x_ref[0]
            # Contiguous [q, v] slab (columns 0:2C) in one matmul.
            proj = (jnp.dot(x, wqkv_ref[:, :2 * C],
                            preferred_element_type=jnp.float32)
                    + bqkv_ref[:, :2 * C])
            q = proj[:, :C]
            v = proj[:, C:]
            q = q - jnp.mean(q, axis=1, keepdims=True)
            q2 = q * q
            q2s = jnp.sum(q2, axis=1, keepdims=True)
            q2t = q2 * pl.reciprocal(q2s + 1e-7, approx=True)
            row_nrm2 = jnp.sum(q2t * q2t, axis=1, keepdims=True)
            q2n = q2t * lax.rsqrt(jnp.maximum(row_nrm2, 1e-24))

        # Column normalization of k2 (global over N) and the 1/sqrt(N) scale,
        # folded into q2n:  t2 = q2n @ (diag(s) @ A) = (q2n * s) @ A.
        q2n = q2n * ss_ref[...]
        t2 = jnp.dot(q2n.astype(jnp.bfloat16), a_bf_ref[...],
                     preferred_element_type=jnp.float32)
        attn = v + t2

        out = (jnp.dot(attn.astype(jnp.bfloat16), wln_ref[...],
                       preferred_element_type=jnp.float32)
               + bln_ref[...])
        o_ref[0] = out.astype(o_ref.dtype)


def essattn_pallas(x, w_qkv, b_qkv, w_ln, b_ln, *, block_n=256, out_dtype=None,
                   stash_budget_bytes=24 * 1024 * 1024):
    """x: (B, N, C) f32; w_qkv: (C, 3C); b_qkv: (1, 3C); w_ln: (C, C); b_ln: (1, C).

    For best performance C should be a multiple of 128 and block_n a multiple
    of 16 (256-512 recommended for real shapes).  `stash_budget_bytes` gates
    the resident q2n/v VMEM stash; the default is sized against v7x's 64 MiB
    per-TensorCore VMEM (32 MiB default scoped limit).
    """
    B, N, C = x.shape
    tn = min(block_n, N)
    assert N % tn == 0, "N must be divisible by the token tile size"
    nt = N // tn
    out_dtype = x.dtype if out_dtype is None else out_dtype
    out_itemsize = jnp.dtype(out_dtype).itemsize

    # Reorder qkv columns [q, k, v] -> [q, v, k] so each phase uses a single
    # contiguous slab.  bf16 MXU operands (halves weight/activation DMA);
    # biases stay f32 and are added to the f32 accumulators.
    w_q, w_k, w_v = w_qkv[:, :C], w_qkv[:, C:2 * C], w_qkv[:, 2 * C:]
    b_q, b_k, b_v = b_qkv[:, :C], b_qkv[:, C:2 * C], b_qkv[:, 2 * C:]
    w_re = jnp.concatenate([w_q, w_v, w_k], axis=1).astype(jnp.bfloat16)
    b_re = jnp.concatenate([b_q, b_v, b_k], axis=1).astype(jnp.float32)
    w_ln_bf = w_ln.astype(jnp.bfloat16)
    b_ln_f32 = b_ln.astype(jnp.float32)
    x_bf = x.astype(jnp.bfloat16)

    stash_bytes = 2 * N * C * 2  # q2n + v stashes, bf16
    use_stash = stash_bytes <= stash_budget_bytes

    scratch = [
        pltpu.VMEM((C, C), jnp.float32),   # A: un-normalized k2t^T @ v
        pltpu.VMEM((1, C), jnp.float32),   # S, then cached combined col scale
        pltpu.VMEM((C, C), jnp.bfloat16),  # cached bf16 copy of A for phase 1
    ]
    if use_stash:
        scratch += [pltpu.VMEM((N, C), jnp.bfloat16),   # q2n stash
                    pltpu.VMEM((N, C), jnp.bfloat16)]   # v stash

    if use_stash:
        # x is only consumed in phase 0; during phase 1 keep its block parked
        # on the last phase-0 tile so no redundant HBM->VMEM DMA is issued.
        x_index = lambda b, p, t: (b, t * (1 - p) + (nt - 1) * p, 0)
    else:
        x_index = lambda b, p, t: (b, t, 0)

    # Advisory cost estimate so XLA can overlap surrounding ops.
    flops = (12 if use_stash else 14) * B * N * C * C
    bytes_accessed = (B * N * C * 2 * (1 if use_stash else 2)   # x reads (bf16)
                      + B * N * C * out_itemsize                # output write
                      + 4 * C * C * 2 + 4 * C * 4)              # weights + biases
    cost = pl.CostEstimate(flops=flops, transcendentals=B * (3 * N + C),
                           bytes_accessed=bytes_accessed)

    # Explicit VMEM limit (predictable double-buffering, v7x has only 64 MiB).
    vmem_est = (4 * C * C * 2 * 2            # weights, bf16, double-buffered
                + 4 * C * 4 * 2              # biases
                + 2 * tn * C * 2             # x tile, double-buffered
                + 2 * tn * C * out_itemsize  # out tile, double-buffered
                + C * C * 4 + C * C * 2 + C * 4
                + (stash_bytes if use_stash else 0))
    vmem_limit = min(128 << 20, max(32 << 20, int(vmem_est * 1.3) + (4 << 20)))

    # Note: the four weight/bias BlockSpecs have constant index_maps so they
    # are DMA'd once; at C >= 1024, pipeline_mode=pl.Buffered(1) on them would
    # free their second buffer (irrelevant at small C, so left at defaults).
    kernel = functools.partial(_essattn_kernel, N=N, C=C, tn=tn,
                               use_stash=use_stash)
    return pl.pallas_call(
        kernel,
        out_shape=jax.ShapeDtypeStruct((B, N, C), out_dtype),
        grid_spec=pltpu.PrefetchScalarGridSpec(
            num_scalar_prefetch=0,
            grid=(B, 2, nt),
            in_specs=[
                pl.BlockSpec((1, tn, C), x_index),
                pl.BlockSpec((C, 3 * C), lambda b, p, t: (0, 0)),
                pl.BlockSpec((1, 3 * C), lambda b, p, t: (0, 0)),
                pl.BlockSpec((C, C), lambda b, p, t: (0, 0)),
                pl.BlockSpec((1, C), lambda b, p, t: (0, 0)),
            ],
            # Phase 0 parks the output window on tile 0 (never flushed until
            # the first phase-1 tile fully overwrites it); phase 1 streams
            # tiles out.  See "parking" note in the header.
            out_specs=pl.BlockSpec((1, tn, C), lambda b, p, t: (b, p * t, 0)),
            scratch_shapes=scratch,
        ),
        compiler_params=pltpu.CompilerParams(
            dimension_semantics=("parallel", "arbitrary", "arbitrary"),
            vmem_limit_bytes=vmem_limit),
        cost_estimate=cost,
    )(x_bf, w_re, b_re, w_ln_bf, b_ln_f32)


def essattn_ref(x, w_qkv, b_qkv, w_ln, b_ln):
    """Pure-JAX f32 reference matching the PyTorch module semantics."""
    B, N, C = x.shape
    qkv = x @ w_qkv + b_qkv[0]
    q, k, v = qkv[..., :C], qkv[..., C:2 * C], qkv[..., 2 * C:]
    q = q - jnp.mean(q, axis=2, keepdims=True)
    k = k - jnp.mean(k, axis=2, keepdims=True)
    q2 = q ** 2
    q2s = jnp.sum(q2, axis=2, keepdims=True)
    k2 = k ** 2
    k2s = jnp.sum(k2, axis=2, keepdims=True)
    t1 = v
    k2 = k2 / (k2s + 1e-7)
    k2 = k2 / jnp.maximum(jnp.linalg.norm(k2, axis=-2, keepdims=True), 1e-12)
    q2 = q2 / (q2s + 1e-7)
    q2 = q2 / jnp.maximum(jnp.linalg.norm(q2, axis=-1, keepdims=True), 1e-12)
    t2 = q2 @ (jnp.swapaxes(k2, -2, -1) @ v) / math.sqrt(N)
    attn = t1 + t2
    return attn @ w_ln + b_ln[0]


if __name__ == "__main__":
    # Small, lane-dense correctness shapes: C = 128 (one full lane tile),
    # N = 64 tokens split into two tiles of 32 so the cross-tile accumulation,
    # the stash path and the streaming fallback are all exercised.
    # (Perf runs should use block_n=256..512; block_n here is test-only.)
    B, N, C = 2, 64, 128

    key = jax.random.PRNGKey(0)
    kx, k1, k2, k3, k4 = jax.random.split(key, 5)

    x = jax.random.normal(kx, (B, N, C), dtype=jnp.float32)
    # Synthetic parameters for nn.Linear(dim, dim*3) and nn.Linear(dim, dim),
    # stored as (in, out) so the kernel does x @ W + b (== torch x @ W^T + b).
    w_qkv = jax.random.normal(k1, (C, 3 * C), dtype=jnp.float32) * (1.0 / math.sqrt(C))
    b_qkv = jax.random.normal(k2, (1, 3 * C), dtype=jnp.float32) * 0.02
    w_ln = jax.random.normal(k3, (C, C), dtype=jnp.float32) * (1.0 / math.sqrt(C))
    b_ln = jax.random.normal(k4, (1, C), dtype=jnp.float32) * 0.02

    ref = essattn_ref(x, w_qkv, b_qkv, w_ln, b_ln)

    # Path 1: q2n / v stashed in VMEM between the two passes (default).
    out = jax.block_until_ready(
        essattn_pallas(x, w_qkv, b_qkv, w_ln, b_ln, block_n=32))
    assert out.shape == (B, N, C)
    err1 = float(jnp.max(jnp.abs(out - ref)))
    assert jnp.allclose(out, ref, atol=3e-2, rtol=3e-2), (
        f"stash path mismatch vs reference (max abs err {err1})")

    # Path 2: streaming fallback (stash disabled) — must match the same ref.
    out2 = jax.block_until_ready(
        essattn_pallas(x, w_qkv, b_qkv, w_ln, b_ln, block_n=32,
                       stash_budget_bytes=0))
    err2 = float(jnp.max(jnp.abs(out2 - ref)))
    assert jnp.allclose(out2, ref, atol=3e-2, rtol=3e-2), (
        f"streaming path mismatch vs reference (max abs err {err2})")

    print("KERNEL_OK")
</pallas_src>

<mosaic_0001>
module attributes {stable_mosaic.version = 11 : i64} {
  func.func @_essattn_kernel(%arg0: i32, %arg1: i32, %arg2: i32, %arg3: memref<1x32x128xbf16, #tpu.memory_space<vmem>>, %arg4: memref<128x384xbf16, #tpu.memory_space<vmem>>, %arg5: memref<1x384xf32, #tpu.memory_space<vmem>>, %arg6: memref<128x128xbf16, #tpu.memory_space<vmem>>, %arg7: memref<1x128xf32, #tpu.memory_space<vmem>>, %arg8: memref<1x32x128xf32, #tpu.memory_space<vmem>>, %arg9: memref<128x128xf32, #tpu.memory_space<vmem>>, %arg10: memref<1x128xf32, #tpu.memory_space<vmem>>, %arg11: memref<128x128xbf16, #tpu.memory_space<vmem>>, %arg12: memref<64x128xbf16, #tpu.memory_space<vmem>>, %arg13: memref<64x128xbf16, #tpu.memory_space<vmem>>) attributes {dimension_semantics = [#tpu.dimension_semantics<parallel>, #tpu.dimension_semantics<arbitrary>, #tpu.dimension_semantics<arbitrary>], iteration_bounds = array<i64: 2, 2, 2>, scalar_prefetch = 0 : i64, scratch_operands = 5 : i64, tpu.core_type = #tpu.core_type<tc>, window_params = [{transform_indices = @transform_0, window_bounds = array<i64: 1, 32, 128>}, {pipeline_mode = #tpu.pipeline_mode<synchronous>, transform_indices = @transform_1, window_bounds = array<i64: 128, 384>}, {pipeline_mode = #tpu.pipeline_mode<synchronous>, transform_indices = @transform_2, window_bounds = array<i64: 1, 384>}, {pipeline_mode = #tpu.pipeline_mode<synchronous>, transform_indices = @transform_3, window_bounds = array<i64: 128, 128>}, {pipeline_mode = #tpu.pipeline_mode<synchronous>, transform_indices = @transform_4, window_bounds = array<i64: 1, 128>}, {transform_indices = @transform_5, window_bounds = array<i64: 1, 32, 128>}]} {
    %c0_i32 = arith.constant 0 : i32
    %0 = arith.cmpi eq, %arg1, %c0_i32 : i32
    %1 = arith.extui %0 : i1 to i32
    %c0_i32_0 = arith.constant 0 : i32
    %2 = arith.cmpi ne, %1, %c0_i32_0 : i32
    scf.if %2 {
      %c0_i32_2 = arith.constant 0 : i32
      %6 = arith.cmpi eq, %arg2, %c0_i32_2 : i32
      %7 = arith.extui %6 : i1 to i32
      %c0_i32_3 = arith.constant 0 : i32
      %8 = arith.cmpi ne, %7, %c0_i32_3 : i32
      scf.if %8 {
        %cst_32 = arith.constant 0.000000e+00 : f32
        %75 = vector.broadcast %cst_32 : f32 to vector<128x128xf32>
        %c0_33 = arith.constant 0 : index
        %c0_34 = arith.constant 0 : index
        %76 = vector.load %arg9[%c0_33, %c0_34] : memref<128x128xf32, #tpu.memory_space<vmem>>, vector<128x128xf32>
        tpu.vector_store %arg9[%c0_33, %c0_34], %75 {strides = array<i32>} : memref<128x128xf32, #tpu.memory_space<vmem>>, vector<128x128xf32>,
        %cst_35 = arith.constant 0.000000e+00 : f32
        %77 = vector.broadcast %cst_35 : f32 to vector<1x128xf32>
        %c0_36 = arith.constant 0 : index
        %c0_37 = arith.constant 0 : index
        %78 = vector.load %arg10[%c0_36, %c0_37] : memref<1x128xf32, #tpu.memory_space<vmem>>, vector<1x128xf32>
        tpu.vector_store %arg10[%c0_36, %c0_37], %77 {strides = array<i32>} : memref<1x128xf32, #tpu.memory_space<vmem>>, vector<1x128xf32>,
      } else {
      }
      %c0 = arith.constant 0 : index
      %c0_4 = arith.constant 0 : index
      %c0_5 = arith.constant 0 : index
      %9 = vector.load %arg3[%c0, %c0_4, %c0_5] : memref<1x32x128xbf16, #tpu.memory_space<vmem>>, vector<1x32x128xbf16>
      %10 = vector.shape_cast %9 : vector<1x32x128xbf16> to vector<32x128xbf16>
      %c0_6 = arith.constant 0 : index
      %c0_7 = arith.constant 0 : index
      %11 = vector.load %arg4[%c0_6, %c0_7] : memref<128x384xbf16, #tpu.memory_space<vmem>>, vector<128x384xbf16>
      %cst = arith.constant dense<0.000000e+00> : vector<32x384xf32>
      %12 = tpu.matmul %10, %11, %cst {dimension_numbers = #tpu.dot_dimension_numbers<[1], [0], [0], [1], [0, 0, 1, 1], [], []>} : vector<32x128xbf16>, vector<128x384xbf16>, vector<32x384xf32> -> vector<32x384xf32>
      %c0_8 = arith.constant 0 : index
      %c0_9 = arith.constant 0 : index
      %13 = vector.load %arg5[%c0_8, %c0_9] : memref<1x384xf32, #tpu.memory_space<vmem>>, vector<1x384xf32>
      %14 = vector.broadcast %13 : vector<1x384xf32> to vector<32x384xf32>
      %15 = arith.addf %12, %14 : vector<32x384xf32>
      %16 = vector.extract_strided_slice %15 {offsets = [0, 0], sizes = [32, 128], strides = [1, 1]} : vector<32x384xf32> to vector<32x128xf32>
      %17 = vector.extract_strided_slice %15 {offsets = [0, 128], sizes = [32, 128], strides = [1, 1]} : vector<32x384xf32> to vector<32x128xf32>
      %18 = vector.extract_strided_slice %15 {offsets = [0, 256], sizes = [32, 128], strides = [1, 1]} : vector<32x384xf32> to vector<32x128xf32>
      %cst_10 = arith.constant dense<0.000000e+00> : vector<32xf32>
      %19 = vector.multi_reduction <add>, %18, %cst_10 [1] : vector<32x128xf32> to vector<32xf32>
      %20 = vector.shape_cast %19 : vector<32xf32> to vector<32x1xf32>
      %cst_11 = arith.constant 1.280000e+02 : f32
      %21 = vector.broadcast %cst_11 : f32 to vector<32x1xf32>
      %22 = arith.divf %20, %21 : vector<32x1xf32>
      %23 = vector.broadcast %22 : vector<32x1xf32> to vector<32x128xf32>
      %24 = arith.subf %18, %23 : vector<32x128xf32>
      %25 = arith.mulf %24, %24 : vector<32x128xf32>
      %cst_12 = arith.constant dense<0.000000e+00> : vector<32xf32>
      %26 = vector.multi_reduction <add>, %25, %cst_12 [1] : vector<32x128xf32> to vector<32xf32>
      %27 = vector.shape_cast %26 : vector<32xf32> to vector<32x1xf32>
      %cst_13 = arith.constant 1.000000e-07 : f32
      %28 = vector.broadcast %cst_13 : f32 to vector<32x1xf32>
      %29 = arith.addf %27, %28 : vector<32x1xf32>
      %30 = tpu.reciprocal %29 {approx = true} : vector<32x1xf32> -> vector<32x1xf32>
      %31 = vector.broadcast %30 : vector<32x1xf32> to vector<32x128xf32>
      %32 = arith.mulf %25, %31 : vector<32x128xf32>
      %c0_14 = arith.constant 0 : index
      %c0_15 = arith.constant 0 : index
      %33 = vector.load %arg10[%c0_14, %c0_15] : memref<1x128xf32, #tpu.memory_space<vmem>>, vector<1x128xf32>
      %34 = arith.mulf %32, %32 : vector<32x128xf32>
      %cst_16 = arith.constant dense<0.000000e+00> : vector<128xf32>
      %35 = vector.multi_reduction <add>, %34, %cst_16 [0] : vector<32x128xf32> to vector<128xf32>
      %36 = vector.shape_cast %35 : vector<128xf32> to vector<1x128xf32>
      %37 = arith.addf %33, %36 : vector<1x128xf32>
      %c0_17 = arith.constant 0 : index
      %c0_18 = arith.constant 0 : index
      %38 = vector.load %arg10[%c0_17, %c0_18] : memref<1x128xf32, #tpu.memory_space<vmem>>, vector<1x128xf32>
      tpu.vector_store %arg10[%c0_17, %c0_18], %37 {strides = array<i32>} : memref<1x128xf32, #tpu.memory_space<vmem>>, vector<1x128xf32>,
      %c0_19 = arith.constant 0 : index
      %c0_20 = arith.constant 0 : index
      %39 = vector.load %arg9[%c0_19, %c0_20] : memref<128x128xf32, #tpu.memory_space<vmem>>, vector<128x128xf32>
      %40 = arith.truncf %32 : vector<32x128xf32> to vector<32x128xbf16>
      %41 = arith.truncf %17 : vector<32x128xf32> to vector<32x128xbf16>
      %cst_21 = arith.constant dense<0.000000e+00> : vector<128x128xf32>
      %42 = tpu.matmul %40, %41, %cst_21 {dimension_numbers = #tpu.dot_dimension_numbers<[0], [0], [1], [1], [0, 1, 1, 1], [], []>} : vector<32x128xbf16>, vector<32x128xbf16>, vector<128x128xf32> -> vector<128x128xf32>
      %43 = arith.addf %39, %42 : vector<128x128xf32>
      %c0_22 = arith.constant 0 : index
      %c0_23 = arith.constant 0 : index
      %44 = vector.load %arg9[%c0_22, %c0_23] : memref<128x128xf32, #tpu.memory_space<vmem>>, vector<128x128xf32>
      tpu.vector_store %arg9[%c0_22, %c0_23], %43 {strides = array<i32>} : memref<128x128xf32, #tpu.memory_space<vmem>>, vector<128x128xf32>,
      %cst_24 = arith.constant dense<0.000000e+00> : vector<32xf32>
      %45 = vector.multi_reduction <add>, %16, %cst_24 [1] : vector<32x128xf32> to vector<32xf32>
      %46 = vector.shape_cast %45 : vector<32xf32> to vector<32x1xf32>
      %cst_25 = arith.constant 1.280000e+02 : f32
      %47 = vector.broadcast %cst_25 : f32 to vector<32x1xf32>
      %48 = arith.divf %46, %47 : vector<32x1xf32>
      %49 = vector.broadcast %48 : vector<32x1xf32> to vector<32x128xf32>
      %50 = arith.subf %16, %49 : vector<32x128xf32>
      %51 = arith.mulf %50, %50 : vector<32x128xf32>
      %cst_26 = arith.constant dense<0.000000e+00> : vector<32xf32>
      %52 = vector.multi_reduction <add>, %51, %cst_26 [1] : vector<32x128xf32> to vector<32xf32>
      %53 = vector.shape_cast %52 : vector<32xf32> to vector<32x1xf32>
      %cst_27 = arith.constant 1.000000e-07 : f32
      %54 = vector.broadcast %cst_27 : f32 to vector<32x1xf32>
      %55 = arith.addf %53, %54 : vector<32x1xf32>
      %56 = tpu.reciprocal %55 {approx = true} : vector<32x1xf32> -> vector<32x1xf32>
      %57 = vector.broadcast %56 : vector<32x1xf32> to vector<32x128xf32>
      %58 = arith.mulf %51, %57 : vector<32x128xf32>
      %59 = arith.mulf %58, %58 : vector<32x128xf32>
      %cst_28 = arith.constant dense<0.000000e+00> : vector<32xf32>
      %60 = vector.multi_reduction <add>, %59, %cst_28 [1] : vector<32x128xf32> to vector<32xf32>
      %61 = vector.shape_cast %60 : vector<32xf32> to vector<32x1xf32>
      %cst_29 = arith.constant 1.000000e-24 : f32
      %62 = vector.broadcast %cst_29 : f32 to vector<32x1xf32>
      %63 = arith.maximumf %61, %62 : vector<32x1xf32>
      %64 = math.rsqrt %63 : vector<32x1xf32>
      %65 = vector.broadcast %64 : vector<32x1xf32> to vector<32x128xf32>
      %66 = arith.mulf %58, %65 : vector<32x128xf32>
      %c32_i32 = arith.constant 32 : i32
      %67 = arith.muli %arg2, %c32_i32 : i32
      %68 = tpu.assume_multiple %67, 32 : i32
      %69 = arith.truncf %66 : vector<32x128xf32> to vector<32x128xbf16>
      %70 = arith.index_cast %68 : i32 to index
      %c0_30 = arith.constant 0 : index
      %71 = vector.load %arg12[%70, %c0_30] : memref<64x128xbf16, #tpu.memory_space<vmem>>, vector<32x128xbf16>
      tpu.vector_store %arg12[%70, %c0_30], %69 {strides = array<i32>} : memref<64x128xbf16, #tpu.memory_space<vmem>>, vector<32x128xbf16>,
      %72 = arith.truncf %17 : vector<32x128xf32> to vector<32x128xbf16>
      %73 = arith.index_cast %68 : i32 to index
      %c0_31 = arith.constant 0 : index
      %74 = vector.load %arg13[%73, %c0_31] : memref<64x128xbf16, #tpu.memory_space<vmem>>, vector<32x128xbf16>
      tpu.vector_store %arg13[%73, %c0_31], %72 {strides = array<i32>} : memref<64x128xbf16, #tpu.memory_space<vmem>>, vector<32x128xbf16>,
    } else {
    }
    %c1_i32 = arith.constant 1 : i32
    %3 = arith.cmpi eq, %arg1, %c1_i32 : i32
    %4 = arith.extui %3 : i1 to i32
    %c0_i32_1 = arith.constant 0 : i32
    %5 = arith.cmpi ne, %4, %c0_i32_1 : i32
    scf.if %5 {
      %c0_i32_2 = arith.constant 0 : i32
      %6 = arith.cmpi eq, %arg2, %c0_i32_2 : i32
      %7 = arith.extui %6 : i1 to i32
      %c0_i32_3 = arith.constant 0 : i32
      %8 = arith.cmpi ne, %7, %c0_i32_3 : i32
      scf.if %8 {
        %c0_17 = arith.constant 0 : index
        %c0_18 = arith.constant 0 : index
        %33 = vector.load %arg9[%c0_17, %c0_18] : memref<128x128xf32, #tpu.memory_space<vmem>>, vector<128x128xf32>
        %34 = arith.truncf %33 : vector<128x128xf32> to vector<128x128xbf16>
        %c0_19 = arith.constant 0 : index
        %c0_20 = arith.constant 0 : index
        %35 = vector.load %arg11[%c0_19, %c0_20] : memref<128x128xbf16, #tpu.memory_space<vmem>>, vector<128x128xbf16>
        tpu.vector_store %arg11[%c0_19, %c0_20], %34 {strides = array<i32>} : memref<128x128xbf16, #tpu.memory_space<vmem>>, vector<128x128xbf16>,
        %c0_21 = arith.constant 0 : index
        %c0_22 = arith.constant 0 : index
        %36 = vector.load %arg10[%c0_21, %c0_22] : memref<1x128xf32, #tpu.memory_space<vmem>>, vector<1x128xf32>
        %cst_23 = arith.constant 1.000000e-24 : f32
        %37 = vector.broadcast %cst_23 : f32 to vector<1x128xf32>
        %38 = arith.maximumf %36, %37 : vector<1x128xf32>
        %39 = math.rsqrt %38 : vector<1x128xf32>
        %cst_24 = arith.constant 1.250000e-01 : f32
        %40 = vector.broadcast %cst_24 : f32 to vector<1x128xf32>
        %41 = arith.mulf %39, %40 : vector<1x128xf32>
        %c0_25 = arith.constant 0 : index
        %c0_26 = arith.constant 0 : index
        %42 = vector.load %arg10[%c0_25, %c0_26] : memref<1x128xf32, #tpu.memory_space<vmem>>, vector<1x128xf32>
        tpu.vector_store %arg10[%c0_25, %c0_26], %41 {strides = array<i32>} : memref<1x128xf32, #tpu.memory_space<vmem>>, vector<1x128xf32>,
      } else {
      }
      %c32_i32 = arith.constant 32 : i32
      %9 = arith.muli %arg2, %c32_i32 : i32
      %10 = tpu.assume_multiple %9, 32 : i32
      %11 = arith.index_cast %10 : i32 to index
      %c0 = arith.constant 0 : index
      %12 = vector.load %arg12[%11, %c0] : memref<64x128xbf16, #tpu.memory_space<vmem>>, vector<32x128xbf16>
      %13 = arith.extf %12 : vector<32x128xbf16> to vector<32x128xf32>
      %14 = arith.index_cast %10 : i32 to index
      %c0_4 = arith.constant 0 : index
      %15 = vector.load %arg13[%14, %c0_4] : memref<64x128xbf16, #tpu.memory_space<vmem>>, vector<32x128xbf16>
      %16 = arith.extf %15 : vector<32x128xbf16> to vector<32x128xf32>
      %c0_5 = arith.constant 0 : index
      %c0_6 = arith.constant 0 : index
      %17 = vector.load %arg10[%c0_5, %c0_6] : memref<1x128xf32, #tpu.memory_space<vmem>>, vector<1x128xf32>
      %18 = vector.broadcast %17 : vector<1x128xf32> to vector<32x128xf32>
      %19 = arith.mulf %13, %18 : vector<32x128xf32>
      %20 = arith.truncf %19 : vector<32x128xf32> to vector<32x128xbf16>
      %c0_7 = arith.constant 0 : index
      %c0_8 = arith.constant 0 : index
      %21 = vector.load %arg11[%c0_7, %c0_8] : memref<128x128xbf16, #tpu.memory_space<vmem>>, vector<128x128xbf16>
      %cst = arith.constant dense<0.000000e+00> : vector<32x128xf32>
      %22 = tpu.matmul %20, %21, %cst {dimension_numbers = #tpu.dot_dimension_numbers<[1], [0], [0], [1], [0, 0, 1, 1], [], []>} : vector<32x128xbf16>, vector<128x128xbf16>, vector<32x128xf32> -> vector<32x128xf32>
      %23 = arith.addf %16, %22 : vector<32x128xf32>
      %24 = arith.truncf %23 : vector<32x128xf32> to vector<32x128xbf16>
      %c0_9 = arith.constant 0 : index
      %c0_10 = arith.constant 0 : index
      %25 = vector.load %arg6[%c0_9, %c0_10] : memref<128x128xbf16, #tpu.memory_space<vmem>>, vector<128x128xbf16>
      %cst_11 = arith.constant dense<0.000000e+00> : vector<32x128xf32>
      %26 = tpu.matmul %24, %25, %cst_11 {dimension_numbers = #tpu.dot_dimension_numbers<[1], [0], [0], [1], [0, 0, 1, 1], [], []>} : vector<32x128xbf16>, vector<128x128xbf16>, vector<32x128xf32> -> vector<32x128xf32>
      %c0_12 = arith.constant 0 : index
      %c0_13 = arith.constant 0 : index
      %27 = vector.load %arg7[%c0_12, %c0_13] : memref<1x128xf32, #tpu.memory_space<vmem>>, vector<1x128xf32>
      %28 = vector.broadcast %27 : vector<1x128xf32> to vector<32x128xf32>
      %29 = arith.addf %26, %28 : vector<32x128xf32>
      %c0_14 = arith.constant 0 : index
      %c0_15 = arith.constant 0 : index
      %c0_16 = arith.constant 0 : index
      %30 = vector.load %arg8[%c0_14, %c0_15, %c0_16] : memref<1x32x128xf32, #tpu.memory_space<vmem>>, vector<1x32x128xf32>
      %31 = vector.shape_cast %30 : vector<1x32x128xf32> to vector<32x128xf32>
      %32 = vector.shape_cast %29 : vector<32x128xf32> to vector<1x32x128xf32>
      tpu.vector_store %arg8[%c0_14, %c0_15, %c0_16], %32 {strides = array<i32>} : memref<1x32x128xf32, #tpu.memory_space<vmem>>, vector<1x32x128xf32>,
    } else {
    }
    return
  }
  func.func @transform_0(%arg0: i32, %arg1: i32, %arg2: i32) -> (i32, i32, i32) {
    %c1_i32 = arith.constant 1 : i32
    %0 = arith.subi %c1_i32, %arg1 : i32
    %1 = arith.muli %arg2, %0 : i32
    %c1_i32_0 = arith.constant 1 : i32
    %2 = arith.muli %c1_i32_0, %arg1 : i32
    %3 = arith.addi %1, %2 : i32
    %c0_i32 = arith.constant 0 : i32
    %c0_i32_1 = arith.constant 0 : i32
    return %arg0, %3, %c0_i32 : i32, i32, i32
  }
  func.func @transform_1(%arg0: i32, %arg1: i32, %arg2: i32) -> (i32, i32) {
    %c0_i32 = arith.constant 0 : i32
    %c0_i32_0 = arith.constant 0 : i32
    %c0_i32_1 = arith.constant 0 : i32
    return %c0_i32, %c0_i32_0 : i32, i32
  }
  func.func @transform_2(%arg0: i32, %arg1: i32, %arg2: i32) -> (i32, i32) {
    %c0_i32 = arith.constant 0 : i32
    %c0_i32_0 = arith.constant 0 : i32
    %c0_i32_1 = arith.constant 0 : i32
    return %c0_i32, %c0_i32_0 : i32, i32
  }
  func.func @transform_3(%arg0: i32, %arg1: i32, %arg2: i32) -> (i32, i32) {
    %c0_i32 = arith.constant 0 : i32
    %c0_i32_0 = arith.constant 0 : i32
    %c0_i32_1 = arith.constant 0 : i32
    return %c0_i32, %c0_i32_0 : i32, i32
  }
  func.func @transform_4(%arg0: i32, %arg1: i32, %arg2: i32) -> (i32, i32) {
    %c0_i32 = arith.constant 0 : i32
    %c0_i32_0 = arith.constant 0 : i32
    %c0_i32_1 = arith.constant 0 : i32
    return %c0_i32, %c0_i32_0 : i32, i32
  }
  func.func @transform_5(%arg0: i32, %arg1: i32, %arg2: i32) -> (i32, i32, i32) {
    %0 = arith.muli %arg1, %arg2 : i32
    %c0_i32 = arith.constant 0 : i32
    %c0_i32_0 = arith.constant 0 : i32
    return %arg0, %0, %c0_i32 : i32, i32, i32
  }
}

</mosaic_0001>

<bundles_post_ra>
// kernel: tpu_custom_call.1
= control target key start
LH: loop header
LB: loop body
LE: loop exit
PB: predicated region body
PF: predicated region fallthrough
CT: control target
= control target key end

     0   :  { %s2714_s0 = inlined_call_operand.hbm [shape: bf16[2,64,128], index: 0, kind: input, shape index: {}]   ;;  %s2715_s1 = inlined_call_operand.hbm [shape: bf16[128,384], index: 1, kind: input, shape index: {}]   ;;  %s2716_s2 = inlined_call_operand.vmem [shape: f32[1,384], index: 2, kind: input, shape index: {}]   ;;  %s2717_s3 = inlined_call_operand.hbm [shape: bf16[128,128], index: 3, kind: input, shape index: {}]   ;;  %s2718_s4 = inlined_call_operand.vmem [shape: f32[1,128], index: 4, kind: input, shape index: {}]   ;;  %s2719_s5 = inlined_call_operand.hbm [shape: f32[2,64,128], index: 5, kind: output, shape index: {}]  }
   0x1   :  { %2736 = sst [smem:[#allocation28_spill]] %s2715_s1 }
   0x2   :  { %2737 = sst [smem:[#allocation29_spill]] %s2716_s2 }
   0x3   :  { %2738 = sst [smem:[#allocation30_spill]] %s2717_s3 }
   0x4   :  { %2739 = sst [smem:[#allocation31_spill]] %s2718_s4 }
   0x5   :  { %2740 = sst [smem:[#allocation32_spill]] %s2719_s5 }
   0x6   :  { %10 = vsyncpa [#allocation8], 0 }
   0x7   :  { %12 = vsyncpa [#allocation8 + $0x1], 0 }
   0x8   :  { %13 = vsyncpa [#allocation11], 0 }
   0x9   :  { %14 = vsyncpa [#allocation9], 0 }
   0xa   :  { %16 = vsyncpa [#allocation9 + $0x1], 0  ;;  %s2349_s18 = smov 0   ;;  %s2351_s19 = smov 0  }
   0xb   :  { %s2353_s20 = smov 0   ;;  %s2355_s21 = smov 0  }
   0xc   :  { %s2357_s22 = smov 0   ;;  %s2359_s23 = smov 0  }
   0xd   :  { %s2361_s24 = smov 0   ;;  %s2363_s25 = smov 0  }
   0xe   :  { %s2365_s26 = smov 0   ;;  %s2367_s27 = smov 0  }
   0xf   :  { %s2369_s28 = smov 0   ;;  %s2371_s29 = smov 0  }
  0x10   :  { %s2373_s30 = smov 0  }
  0x11 LB: > { %2741 = sst [smem:[#allocation17_spill]] %s2257_s18  ;;  %s1520_s6 = sadd.s32 4294967295, %s2305_s30   ;;  %s2305_s30 = sphi %s2373_s30, %s22_s30   ;;  %s2301_s29 = sphi %s2371_s29, %s2798_s29   ;;  %s2297_s28 = sphi %s2369_s28, %s2797_s28   ;;  %s2293_s27 = sphi %s2367_s27, %s2796_s27   ;;  %s2289_s26 = sphi %s2365_s26, %s2795_s26   ;;  %s2285_s25 = sphi %s2363_s25, %s2787_s25   ;;  %s2281_s24 = sphi %s2361_s24, %s2786_s24   ;;  %s2277_s23 = sphi %s2359_s23, %s2794_s23   ;;  %s2273_s22 = sphi %s2357_s22, %s2793_s22   ;;  %s2269_s21 = sphi %s2355_s21, %s2792_s21   ;;  %s2265_s20 = sphi %s2353_s20, %s2791_s20   ;;  %s2261_s19 = sphi %s2351_s19, %s2790_s19   ;;  %s2257_s18 = sphi %s2349_s18, %s2785_s18  }
  0x12   : > { %2742 = sst [smem:[#allocation18_spill]] %s2261_s19  ;;  %s1521_s7 = sadd.s32 4294967294, %s2305_s30  }
  0x13   : > { %2743 = sst [smem:[#allocation19_spill]] %s2281_s24  ;;  %p69_p0 = scmp.ne.s32.totalorder %s2273_s22, %s2269_s21 }
  0x14   : > { %2744 = sst [smem:[#allocation20_spill]] %s2285_s25  ;;  %p2415_p1 = scmp.eq.s32.totalorder %s1520_s6, 0 }
  0x15   : > { %2745 = sst [smem:[#allocation21_spill]] %s2289_s26  ;;  %p180_p2 = scmp.ne.s32.totalorder %s2265_s20, %s2261_s19 }
  0x16   : > { %2746 = sst [smem:[#allocation22_spill]] %s2293_s27  ;;  %p181_p3 = scmp.eq.s32.totalorder %s1520_s6, 7 }
  0x17   : > { %2747 = sst [smem:[#allocation23_spill]] %s2297_s28  ;;  %p2423_p4 = por %p2415_p1, %p69_p0 }
  0x18   : > { %s2748_s8 = scalar_select %p2415_p1, 1, 0 }
  0x19   : > { %p186_p5 = scmp.ne.s32.totalorder %s2261_s19, %s2257_s18  ;;  %p2429_p6 = por %p181_p3, %p180_p2 }
  0x1a   : > { %p187_p7 = scmp.eq.s32.totalorder %s1521_s7, 7  ;;  %p1522_p8 = scmp.ge.s32.totalorder %s2305_s30, 1 }
  0x1b   : > { %s2750_s10 = scalar_select %p2429_p6, 1, 0 }
  0x1c   : > { %p194_p9 = scmp.lt.s32.totalorder %s2305_s30, 9  ;;  %p2435_p10 = por %p187_p7, %p186_p5 }
  0x1d   : > { %2751 = sst [smem:[#allocation24_spill]] %s2750_s10  ;;  %s2307_s13 = smov [#allocation10]  }
  0x1e   : > { %s2752_s11 = scalar_select %p2435_p10, 1, 0 }
  0x1f   : > { %p2439_p11 = pnand %p1522_p8, %p194_p9  ;;  %s206_s14 = sshll.u32 %s2307_s13, 4  ;;  %s207_s14 = int_to_ptr.vmem [resolvable:$true] %s206_s14 }
  0x20   : > { %2753 = sst [smem:[#allocation25_spill]] %s2752_s11  ;;  %s2308_s16 = smov [#allocation12]  }
  0x21   : > { %p1874_p12 = pneg %p2439_p11  ;;  %s222_s17 = sshll.u32 %s2308_s16, 4  ;;  %s223_s17 = int_to_ptr.vmem [resolvable:$true] %s222_s17 }
  0x22   : > { %s2096_s21 = scalar_lea.vmem %s207_s14, 3072  ;;  %p2104_p7 = scmp.lt.s32.totalorder %s207_s14, %s207_s14 }
  0x23   : > { %p2447_p13 = pnand %p1874_p12, %p2415_p1  ;;  %p2097_p2 = scmp.ne.s32.totalorder %s207_s14, %s2096_s21 }
  0x24   : > { %p2105_p8 = scmp.lt.s32.totalorder %s2096_s21, %s2096_s21 }
  0x25   : > { %p2087_p0 = pneg %p2447_p13 }
  0x26   : > { %p2106_p9 = por %p2105_p8, %p2104_p7 }
  0x27   : > { %p2099_p3 = pnand %p2097_p2, %p2087_p0 }
  0x29   : > { %p2100_p5 = pneg %p2099_p3 }
  0x2b   : > { %p2107_p12 = pnand %p2106_p9, %p2100_p5 }
  0x2d   : > { %2110 = shalt.err (!%p2107_p12)
}
  0x2e   : > { %s2309_s6 = smov 192   ;;  %s2310_s7 = smov 12  }
  0x2f   : > { %s2756_s1 = sld [smem:[#allocation28_spill]]  ;;  %s2122_s11 = scalar_lea.vmem %s223_s17, 1024 }
  0x30   : > { %p2123_p10 = scmp.ne.s32.totalorder %s223_s17, %s2122_s11  ;;  %p2130_p6 = scmp.lt.s32.totalorder %s223_s17, %s223_s17 }
  0x31   : > { %p2131_p1 = scmp.lt.s32.totalorder %s2122_s11, %s2122_s11 }
  0x32   : > { %p2125_p2 = pnand %p2123_p10, %p2087_p0 }
  0x33   : > { %p2132_p7 = por %p2131_p1, %p2130_p6 }
  0x34   : > { %p2126_p3 = pneg %p2125_p2 }
  0x35   : > { %1877 = dma.hbm_to_vmem [thread:$0]  (!%p2447_p13), %s2756_s1, 3072, %s207_s14, [#allocation11], %s2309_s6, %s2309_s6, %s2310_s7  }
  0x36   : > { %p2133_p5 = pnand %p2132_p7, %p2126_p3 }
  0x38   : > { %2136 = shalt.err (!%p2133_p5)
}
  0x39   : > { %s2725_s21 = smov 64   ;;  %s2726_s14 = smov 4  }
  0x3a   : > { %s2757_s3 = sld [smem:[#allocation30_spill]]  ;;  %s34_s7 = sadd.s32 1, %s2293_s27 }
  0x3b   : > { %p35_p1 = scmp.ge.s32.totalorder %s34_s7, 2  ;;  %s37_s13 = sadd.s32 1, %s2297_s28 }
  0x3c   : > { %s41_s16 = sadd.s32 1, %s2301_s29  ;;  %s45_s1 = ssub.s32 1, %s2297_s28 }
  0x3d   : > { %s2800_s7 = smov (%p35_p1, %s34_s7), 0  ;;  %s2802_s13 = smov (!%p35_p1, %s37_s13), %s2297_s28 }
  0x3e   : > { %s46_s15 = smul.u32 %s2293_s27, %s45_s1  ;;  %s56_s18 = sadd.s32 1, %s2277_s23 }
  0x3f   : > { %p39_p6 = scmp.ge.s32.totalorder %s2802_s13, 2  ;;  %p63_p10 = scmp.ne.s32.totalorder %s2277_s23, %s2273_s22 }
  0x40   : > { %1880 = dma.hbm_to_vmem [thread:$0]  (!%p2447_p13), %s2757_s3, 1024, %s223_s17, [#allocation11], %s2725_s21, %s2725_s21, %s2726_s14  }
  0x41   : > { %s47_s11 = sadd.s32 %s2297_s28, %s46_s15  ;;  %p64_p13 = scmp.eq.s32.totalorder %s2305_s30, 0 }
  0x42   : > { %s2804_s13 = smov (%p39_p6, %s2802_s13), 0  ;;  %s2806_s16 = smov (!%p39_p6, %s41_s16), %s2301_s29 }
  0x43   : > { %2758 = sst [smem:[#allocation26_spill]] %s2804_s13  ;;  %s48_s17 = ssub.s32 1, %s2804_s13 }
  0x44   : > { %p2489_p0 = por %p64_p13, %p63_p10  ;;  %p43_p8 = scmp.ge.s32.totalorder %s2806_s16, 2 }
  0x45   : > { %s49_s1 = smul.u32 %s48_s17, %s2800_s7  ;;  %s170_s15 = sadd.s32 1, %s2265_s20 }
  0x46   : > { %s163_s21 = smul.u32 %s2293_s27, %s2297_s28  ;;  %s2808_s16 = smov (%p43_p8, %s2806_s16), 0 }
  0x47   : > { %2760 = sst [smem:[#allocation27_spill]] %s2808_s16  ;;  %s50_s14 = sadd.s32 %s49_s1, %s2804_s13 }
  0x48   : > { %s164_s3 = smul.u32 %s2804_s13, %s2800_s7  ;;  %s51_s5 = ssub.s32 %s2301_s29, %s2808_s16 }
  0x49   : > { %s52_s10 = ssub.s32 %s47_s11, %s50_s14  ;;  %p1891_p2 = scmp.lt.s32.totalorder %s2305_s30, 8 }
  0x4a   : > { %s53_s26 = sor.u32 %s52_s10, %s51_s5  ;;  %s166_s4 = ssub.s32 %s163_s21, %s164_s3 }
  0x4b   : > { %p54_p9 = scmp.eq.s32.totalorder %s53_s26, 0  ;;  %s167_s2 = sor.u32 %s166_s4, %s51_s5 }
  0x4c   : > { %p168_p12 = scmp.eq.s32.totalorder %s167_s2, 0  ;;  %s239_s27 = sand.u32 1, %s2277_s23  }
  0x4d   : > { %s2506_s17 = scalar_select %p54_p9, %s2277_s23, %s56_s18  }
  0x4e   : > { %s2509_s28 = scalar_select %p168_p12, %s2265_s20, %s170_s15  }
  0x4f   : > { %s1527_s24 = sshll.u32 %s47_s11, 2  ;;  %s1526_s25 = sshll.u32 %s239_s27, 4 }
  0x50   : > { %s1528_s19 = sshll.u32 %s2301_s29, 3  ;;  %s243_s13 = scalar_lea.vmem [#allocation7], %s1526_s25 }
  0x51   : > { %s252_s1 = sadd.s32 %s1528_s19, %s1527_s24  ;;  %s255_s16 = sshll.u32 %s243_s13, 4  ;;  %s2513_s16 = int_to_ptr.vmem [resolvable:$true] %s255_s16 }
  0x52   : > { %s1529_s14 = sshll.u32 %s252_s1, 6  ;;  %p2524_p3 = pnand %p1891_p2, %p2489_p0 }
  0x53   : > { %s2518_s4 = scalar_lea.hbm %s2714_s0, %s1529_s14  ;;  %s240_s5 = scalar_lea.sflag [#allocation8], %s239_s27 }
  0x54   : > { %s2137_s18 = scalar_lea.hbm %s2518_s4, 256  ;;  %p2139_p5 = pneg %p2524_p3 }
  0x55   : > { %p2138_p7 = scmp.ne.s32.totalorder %s2518_s4, %s2137_s18  ;;  %s2142_s25 = scalar_lea.hbm %s2714_s0, 1024 }
  0x56   : > { %p2144_p10 = scmp.lt.s32.totalorder %s2142_s25, %s2137_s18 }
  0x57   : > { %p2140_p1 = pnand %p2139_p5, %p2138_p7 }
  0x59   : > { %p2141_p6 = pneg %p2140_p1 }
  0x5b   : > { %p2146_p13 = pnand %p2144_p10, %p2141_p6 }
  0x5d   : > { %2149 = shalt.err (!%p2146_p13)
}
  0x5e   : > { %s2150_s10 = scalar_lea.vmem %s2513_s16, 256  ;;  %s2313_s27 = smov [#allocation7]  }
  0x5f   : > { %p2151_p0 = scmp.ne.s32.totalorder %s2513_s16, %s2150_s10  ;;  %s2155_s21 = sshll.u32 %s2313_s27, 4  ;;  %s2156_s21 = int_to_ptr.vmem [resolvable:$false] %s2155_s21 }
  0x60   : > { %s2157_s13 = scalar_lea.vmem %s2156_s21, 512  ;;  %p2158_p12 = scmp.lt.s32.totalorder %s2513_s16, %s2156_s21 }
  0x61   : > { %p2153_p8 = pnand %p2151_p0, %p2139_p5  ;;  %p2159_p2 = scmp.lt.s32.totalorder %s2157_s13, %s2150_s10 }
  0x63   : > { %p2154_p9 = pneg %p2153_p8  ;;  %p2160_p7 = por %p2159_p2, %p2158_p12 }
  0x65   : > { %p2161_p1 = pnand %p2160_p7, %p2154_p9 }
  0x67   : > { %2164 = shalt.err (!%p2161_p1)
}
  0x68   : > { %s2762_s11 = smov 4   ;;  %s2763_s6 = smov 64  }
  0x69   : > { %1884 = dma.hbm_to_vmem [thread:$0]  (!%p2524_p3), %s2518_s4, 256, %s2513_s16, %s240_s5, %s2763_s6, %s2763_s6, %s2762_s11  }
  0x6a   : > { %267 = sbr.rel (%p2439_p11) target bundleno = 1525 (0x5f5), region = 40  ;;  %s269_s15 = sand.u32 (!%p2439_p11), 1, %s2273_s22  }
  0x6b   : > { %s2548_s1 = sshll.u32 (!%p2439_p11), %s269_s15, 4  ;;  %s270_s14 = scalar_lea.sflag (!%p2439_p11), [#allocation8], %s269_s15 }
  0x6c   : > { %s273_s3 = scalar_lea.vmem (!%p2439_p11), [#allocation7], %s2548_s1 }
  0x6f   : > { %2244 = dma.done.wait (%p2423_p4), %s270_s14, 256  }
  0x70   : > { %2246 = vsyncadd (%p2423_p4), %s270_s14, 4294967040  ;;  %p2764_p5 = scmp.ne.s32.totalorder %s2748_s8, 0 }
  0x72   : > { %2248 = dma.done.wait (%p2764_p5), [#allocation11], 4096  }
  0x73   : > { %2250 = vsyncadd (%p2764_p5), [#allocation11], 4294963200  ;;  %s2765_s12 = sld [smem:[#allocation18_spill]] }
  0x74   : > { %s2766_s2 = sld [smem:[#allocation20_spill]] }
  0x79   : > { %s305_s16 = sand.u32 1, %s2765_s12  }
  0x7a   : > { %s1534_s26 = sshll.u32 %s305_s16, 5  ;;  %p1535_p11 = scmp.ne.s32.totalorder %s2766_s2, 0 }
  0x7b   : > { %s2562_s4 = scalar_lea.vmem [#allocation13], %s1534_s26  ;;  %s2767_s5 = sld [smem:[#allocation19_spill]] (!%p1535_p11) }
  0x7c   : > { %318 = sbr.rel (%p1535_p11) target bundleno = 1011 (0x3f3), region = 56 }
  0x81   : > { %p1536_p3 = scmp.ne.s32.totalorder %s2767_s5, 0 }
  0x83   : > { %322 = sbr.rel (%p1536_p3) target bundleno = 146 (0x92), region = 60 }
  0x88   : > { %v2314_v0 = vmov 0.0  }
  0x89   : > { %323 = vst [vmem:[#allocation2 + $0x30] sm:$0xff] %v2314_v0  ;;  %324 = vst [vmem:[#allocation2] sm:$0xff] %v2314_v0 }
  0x8a   : > { %325 = vst [vmem:[#allocation2 + $0x58] sm:$0xff] %v2314_v0  ;;  %326 = vst [vmem:[#allocation2 + $0x18] sm:$0xff] %v2314_v0 }
  0x8b   : > { %327 = vst [vmem:[#allocation2 + $0x50] sm:$0xff] %v2314_v0  ;;  %328 = vst [vmem:[#allocation2 + $0x68] sm:$0xff] %v2314_v0 }
  0x8c   : > { %329 = vst [vmem:[#allocation2 + $0x8] sm:$0xff] %v2314_v0  ;;  %330 = vst [vmem:[#allocation2 + $0x48] sm:$0xff] %v2314_v0 }
  0x8d   : > { %331 = vst [vmem:[#allocation2 + $0x40] sm:$0xff] %v2314_v0  ;;  %332 = vst [vmem:[#allocation2 + $0x20] sm:$0xff] %v2314_v0 }
  0x8e   : > { %333 = vst [vmem:[#allocation2 + $0x10] sm:$0xff] %v2314_v0  ;;  %334 = vst [vmem:[#allocation2 + $0x38] sm:$0xff] %v2314_v0 }
  0x8f   : > { %335 = vst [vmem:[#allocation2 + $0x60] sm:$0xff] %v2314_v0  ;;  %336 = vst [vmem:[#allocation2 + $0x70] sm:$0xff] %v2314_v0 }
  0x90   : > { %337 = vst [vmem:[#allocation2 + $0x78] sm:$0xff] %v2314_v0  ;;  %338 = vst [vmem:[#allocation2 + $0x28] sm:$0xff] %v2314_v0 }
  0x91   : > { %339 = vst [vmem:[#allocation3] sm:$0x1] %v2314_v0 }
  0x92 PF: > { %v2009_v1 = vld [vmem:[#allocation10 + $0xb0] ss:$12 sps:$4 sm:$0xff]   ;;  %v2010_v2 = vld [vmem:[#allocation10 + $0x98] ss:$12 sps:$4 sm:$0xff]   ;;  %v2011_v3 = vld [vmem:[#allocation10 + $0x80] ss:$12 sps:$4 sm:$0xff]   ;;  %v378_v28 = vlaneseq }
  0x93   : > { %1778 = vmatprep.subr.bf16.mxu1 %v2009_v1  ;;  %v2012_v4 = vld [vmem:[#allocation10 + $0x68] ss:$12 sps:$4 sm:$0xff]   ;;  %v2315_v6 = vmov 0   ;;  %v2019_v7 = vld [vmem:[#allocation10 + $0xac] ss:$12 sps:$4 sm:$0xff]   ;;  %s2768_s18 = sld [smem:[#allocation29_spill]] }
  0x94   : > { %1779 = vmatpush3.bf16.msra.mxu1 %v2009_v1  ;;  %v2017_v5 = vld [vmem:[%s273_s3] sm:$0xff]   ;;  %565 = vmatprep.mubr.bf16.mxu0 %v2315_v6  ;;  %v2025_v12 = vld [vmem:[#allocation10 + $0x7c] ss:$12 sps:$4 sm:$0xff]   ;;  %v2031_v18 = vld [vmem:[#allocation10 + $0x4c] ss:$12 sps:$4 sm:$0xff]   ;;  %v2570_v29 = vshrl.u32 %v378_v28, 7 }
  0x95   : > { %1780 = vmatprep.subr.bf16.mxu1 %v2010_v2  ;;  %1794 = vmatprep.mubr.bf16.mxu1 %v2017_v5  ;;  %v2021_v8 = vld [vmem:[#allocation10 + $0xa8] ss:$12 sps:$4 sm:$0xff]   ;;  %v2013_v9 = vld [vmem:[#allocation10 + $0x50] ss:$12 sps:$4 sm:$0xff]   ;;  %v2014_v13 = vld [vmem:[#allocation10 + $0x38] ss:$12 sps:$4 sm:$0xff]  }
  0x96   : > { %533 = vmatprep.subr.bf16.mxu0 %v2019_v7  ;;  %v2022_v10 = vld [vmem:[#allocation10 + $0x94] ss:$12 sps:$4 sm:$0xff]   ;;  %v2024_v11 = vld [vmem:[#allocation10 + $0x90] ss:$12 sps:$4 sm:$0xff]   ;;  %v2027_v14 = vld [vmem:[#allocation10 + $0x78] ss:$12 sps:$4 sm:$0xff]  }
  0x97   : > { %534 = vmatpush1.bf16.msra.mxu0 %v2021_v8  ;;  %v2028_v15 = vld [vmem:[#allocation10 + $0x64] ss:$12 sps:$4 sm:$0xff]   ;;  %v2015_v16 = vld [vmem:[#allocation10 + $0x20] ss:$12 sps:$4 sm:$0xff]   ;;  %v2016_v19 = vld [vmem:[#allocation10 + $0x8] ss:$12 sps:$4 sm:$0xff]  }
  0x98   : > { %1781 = vmatpush3.bf16.msra.mxu1 %v2010_v2  ;;  %535 = vmatprep.subr.bf16.mxu0 %v2022_v10  ;;  %v2030_v17 = vld [vmem:[#allocation10 + $0x60] ss:$12 sps:$4 sm:$0xff]   ;;  %v2033_v20 = vld [vmem:[#allocation10 + $0x48] ss:$12 sps:$4 sm:$0xff]   ;;  %v2036_v22 = vld [vmem:[#allocation10 + $0x30] ss:$12 sps:$4 sm:$0xff]  }
  0x99   : > { %1782 = vmatprep.subr.bf16.mxu1 %v2011_v3  ;;  %v2034_v21 = vld [vmem:[#allocation10 + $0x34] ss:$12 sps:$4 sm:$0xff]   ;;  %v2018_v23 = vld [vmem:[%s273_s3 + $0x8] sm:$0xff]   ;;  %v2040_v26 = vld [vmem:[#allocation10 + $0x4] ss:$12 sps:$4 sm:$0xff]   ;;  %v388_v30 = vsub.s32 2, %v2570_v29 }
  0x9a   : > { %v2037_v24 = vld [vmem:[#allocation10 + $0x1c] ss:$12 sps:$4 sm:$0xff]   ;;  %v2039_v25 = vld [vmem:[#allocation10 + $0x18] ss:$12 sps:$4 sm:$0xff]   ;;  %v2042_v27 = vld [vmem:[#allocation10] ss:$12 sps:$4 sm:$0xff]  }
  0x9b   : > { %536 = vmatpush1.bf16.msra.mxu0 %v2024_v11  ;;  %v376_v31 = vld [vmem:[%s2768_s18] sm:$0x7]  ;;  %s2769_s19 = sld [smem:[#allocation19_spill]]  ;;  %v384_v42 = vsub.s32 1, %v2570_v29  ;;  %vm728_vm0 = vcmask 261120  }
  0x9c   : > { %1783 = vmatpush3.bf16.msra.mxu1 %v2011_v3  ;;  %537 = vmatprep.subr.bf16.mxu0 %v2025_v12  ;;  %v389_v32 = vrot.slane %v376_v31, %v388_v30 }
  0x9d   : > { %1784 = vmatprep.subr.bf16.mxu1 %v2012_v4  ;;  %v385_v44 = vrot.slane %v376_v31, %v384_v42 }
  0x9f   : > { %538 = vmatpush1.bf16.msra.mxu0 %v2027_v14 }
  0xa0   : > { %1785 = vmatpush3.bf16.msra.mxu1 %v2012_v4  ;;  %539 = vmatprep.subr.bf16.mxu0 %v2028_v15  ;;  %v380_v4 = vsub.s32 0, %v2570_v29 }
  0xa1   : > { %1786 = vmatprep.subr.bf16.mxu1 %v2013_v9  ;;  %s1571_s24 = sshll.u32 %s2769_s19, 5 }
  0xa2   : > { %s2578_s25 = sshra.s32 %s1571_s24, 3 }
  0xa3   : > { %540 = vmatpush1.bf16.msra.mxu0 %v2030_v17  ;;  %s1576_s10 = sshll.u32 %s2578_s25, 2 }
  0xa4   : > { %1787 = vmatpush3.bf16.msra.mxu1 %v2013_v9  ;;  %541 = vmatprep.subr.bf16.mxu0 %v2031_v18  ;;  %s986_s27 = scalar_lea.vmem [#allocation6], %s1576_s10  ;;  %v381_v9 = vrot.slane %v376_v31, %v380_v4  ;;  %s966_s21 = scalar_lea.vmem [#allocation5], %s1576_s10 }
  0xa5   : > { %1788 = vmatprep.subr.bf16.mxu1 %v2014_v13 }
  0xa7   : > { %542 = vmatpush1.bf16.msra.mxu0 %v2033_v20 }
  0xa8   : > { %1789 = vmatpush3.bf16.msra.mxu1 %v2014_v13  ;;  %543 = vmatprep.subr.bf16.mxu0 %v2034_v21 }
  0xa9   : > { %1790 = vmatprep.subr.bf16.mxu1 %v2015_v16 }
  0xab   : > { %544 = vmatpush1.bf16.msra.mxu0 %v2036_v22 }
  0xac   : > { %1791 = vmatpush3.bf16.msra.mxu1 %v2015_v16  ;;  %545 = vmatprep.subr.bf16.mxu0 %v2037_v24 }
  0xad   : > { %1792 = vmatprep.subr.bf16.mxu1 %v2016_v19 }
  0xaf   : > { %546 = vmatpush1.bf16.msra.mxu0 %v2039_v25 }
  0xb0   : > { %1793 = vmatpush3.bf16.msra.mxu1 %v2016_v19  ;;  %547 = vmatprep.subr.bf16.mxu0 %v2040_v26 }
  0xb3   : > { %1795 = vmatmul.mubr.bf16.vlgmr.msra.gmra.mxu1 %v2018_v23  ;;  %548 = vmatpush1.bf16.msra.mxu0 %v2042_v27 }
  0xb6   : > { %566 = vmatmul.mubr.bf16.vlgmr.msra.gmra.mxu0 %v2017_v5 }
  0xb7   : > { %575 = vmatprep.mubr.bf16.mxu0 %v2315_v6 }
  0xbe   : > { %576 = vmatmul.mubr.bf16.gmra.mxu0 %v2018_v23 }
 0x173   : > { %v1796_v33 = vpop.f32.mrf.mxu1 }
 0x174   : > { %v629_v34 = vadd.f32 %v1796_v33, %v389_v32 }
 0x175   : > { %v620_v35 = vpop.f32.mrf.mxu1 }
 0x176   : > { %v621_v36 = vadd.f32 %v620_v35, %v389_v32  ;;  %639 = vadd.xlane.f32.xlu1 %v629_v34  ;;  %v567_v41 = vpop.f32.mrf.mxu0 }
 0x177   : > { %v1797_v37 = vpop.f32.mrf.mxu1  ;;  %v568_v11 = vadd.f32 %v567_v41, %v381_v9 }
 0x178   : > { %v632_v38 = vadd.f32 %v1797_v37, %v389_v32  ;;  %635 = vadd.xlane.f32.xlu0 %v621_v36  ;;  %v569_v43 = vpop.f32.mrf.mxu0 }
 0x179   : > { %v623_v39 = vpop.f32.mrf.mxu1  ;;  %v570_v46 = vadd.f32 %v569_v43, %v385_v44 }
 0x17a   : > { %v624_v40 = vadd.f32 %v623_v39, %v389_v32  ;;  %641 = vadd.xlane.f32.xlu1 %v632_v38  ;;  %v571_v45 = vpop.f32.mrf.mxu0 }
 0x17b   : > { %v572_v12 = vadd.f32 %v571_v45, %v381_v9 }
 0x17c   : > { %637 = vadd.xlane.f32.xlu0 %v624_v40  ;;  %v573_v47 = vpop.f32.mrf.mxu0 }
 0x17d   : > { %v574_v48 = vadd.f32 %v573_v47, %v385_v44 }
 0x17e   : > { %v577_v49 = vpop.f32.mrf.mxu0 }
 0x17f   : > { %v710_v50 = vpack.c.bf16 %v574_v48, %v570_v46  ;;  %v578_v13 = vadd.f32 %v577_v49, %v381_v9 }
 0x180   : > { %v579_v51 = vpop.f32.mrf.mxu0 }
 0x181   : > { %1665 = vst [vmem:[%s986_s27] sm:$0xff] %v710_v50   ;;  %v580_v53 = vadd.f32 %v579_v51, %v385_v44 }
 0x182   : > { %v581_v52 = vpop.f32.mrf.mxu0 }
 0x183   : > { %v582_v14 = vadd.f32 %v581_v52, %v381_v9 }
 0x184   : > { %v583_v54 = vpop.f32.mrf.mxu0 }
 0x185   : > { %v584_v55 = vadd.f32 %v583_v54, %v385_v44 }
 0x187   : > { %v711_v56 = vpack.c.bf16 %v584_v55, %v580_v53 }
 0x189   : > { %1728 = vst [vmem:[%s986_s27 + $0x8] sm:$0xff] %v711_v56   ;;  %1798 = vmatprep.subr.bf16.mxu0 %v711_v56  ;;  %1858 = vmatprep.subr.bf16.mxu1 %v711_v56 }
 0x18a   : > { %1799 = vmatpush3.bf16.msra.mxu0 %v711_v56  ;;  %1860 = vmatpush3.bf16.msra.mxu1 %v711_v56 }
 0x18b   : > { %1800 = vmatprep.subr.bf16.mxu0 %v710_v50  ;;  %1859 = vmatprep.subr.bf16.mxu1 %v710_v50 }
 0x18e   : > { %1801 = vmatpush3.bf16.msra.mxu0 %v710_v50  ;;  %1861 = vmatpush3.bf16.msra.mxu1 %v710_v50 }
 0x1ff   : > { %v640_v57 = vpop.xlane.xlu1 %639 }
 0x200   : > { %v646_v59 = vmul.f32 0.0078125, %v640_v57 }
 0x201   : > { %v636_v58 = vpop.xlane.xlu0 %635 }
 0x202   : > { %v644_v60 = vmul.f32 0.0078125, %v636_v58  ;;  %v650_v3 = vsub.f32 %v629_v34, %v646_v59 }
 0x203   : > { %v642_v61 = vpop.xlane.xlu1 %641 }
 0x204   : > { %v648_v62 = vsub.f32 %v621_v36, %v644_v60  ;;  %v647_v0 = vmul.f32 0.0078125, %v642_v61  ;;  %v654_v6 = vmul.f32 %v650_v3, %v650_v3  ;;  %v676_v61 = vld [vmem:[#allocation3] sm:$0x1] }
 0x205   : > { %v638_v63 = vpop.xlane.xlu0 %637 }
 0x206   : > { %v645_v1 = vmul.f32 0.0078125, %v638_v63  ;;  %v652_v2 = vmul.f32 %v648_v62, %v648_v62  ;;  %v651_v8 = vsub.f32 %v632_v38, %v647_v0 }
 0x208   : > { %656 = vadd.xlane.f32.xlu0 %v652_v2  ;;  %v649_v5 = vsub.f32 %v624_v40, %v645_v1  ;;  %v655_v10 = vmul.f32 %v651_v8, %v651_v8 }
 0x20a   : > { %v653_v7 = vmul.f32 %v649_v5, %v649_v5 }
 0x20c   : > { %660 = vadd.xlane.f32.xlu0 %v654_v6  ;;  %658 = vadd.xlane.f32.xlu1 %v653_v7 }
 0x210   : > { %662 = vadd.xlane.f32.xlu1 %v655_v10 }
 0x214   : > { %882 = vadd.xlane.f32.xlu1 %v568_v11 }
 0x218   : > { %884 = vadd.xlane.f32.xlu1 %v572_v12 }
 0x21c   : > { %886 = vadd.xlane.f32.xlu1 %v578_v13 }
 0x220   : > { %888 = vadd.xlane.f32.xlu1 %v582_v14 }
 0x291   : > { %v657_v15 = vpop.xlane.xlu0 %656 }
 0x292   : > { %v664_v16 = vadd.f32 1e-07, %v657_v15 }
 0x294   : > { %2043 = vrcp.f32 %v664_v16 }
 0x295   : > { %v659_v17 = vpop.xlane.xlu1 %658  ;;  %v661_v18 = vpop.xlane.xlu0 %660 }
 0x296   : > { %v665_v19 = vadd.f32 1e-07, %v659_v17  ;;  %v666_v20 = vadd.f32 1e-07, %v661_v18 }
 0x298   : > { %2045 = vrcp.f32 %v665_v19 }
 0x299   : > { %2047 = vrcp.f32 %v666_v20  ;;  %v663_v21 = vpop.xlane.xlu1 %662 }
 0x29a   : > { %v667_v22 = vadd.f32 1e-07, %v663_v21 }
 0x29c   : > { %2049 = vrcp.f32 %v667_v22 }
 0x29d   : > { %v883_v23 = vpop.xlane.xlu1 %882 }
 0x29e   : > { %v890_v24 = vmul.f32 0.0078125, %v883_v23 }
 0x2a0   : > { %v894_v25 = vsub.f32 %v568_v11, %v890_v24 }
 0x2a1   : > { %v2044_v26 = vpop.eup %2043  ;;  %v885_v27 = vpop.xlane.xlu1 %884 }
 0x2a2   : > { %v891_v28 = vmul.f32 0.0078125, %v885_v27  ;;  %v2584_v29 = vmul.f32 %v894_v25, %v894_v25  ;;  %v672_v31 = vmul.f32 %v2044_v26, %v652_v2 }
 0x2a4   : > { %902 = vadd.xlane.f32.xlu1 %v2584_v29  ;;  %v895_v30 = vsub.f32 %v572_v12, %v891_v28  ;;  %v677_v41 = vmul.f32 %v672_v31, %v672_v31 }
 0x2a5   : > { %v2046_v32 = vpop.eup %2045  ;;  %v887_v33 = vpop.xlane.xlu1 %886 }
 0x2a6   : > { %v2048_v34 = vpop.eup %2047  ;;  %v892_v35 = vmul.f32 0.0078125, %v887_v33  ;;  %v2587_v36 = vmul.f32 %v895_v30, %v895_v30  ;;  %v673_v37 = vmul.f32 %v2046_v32, %v653_v7 }
 0x2a7   : > { %v674_v38 = vmul.f32 %v2048_v34, %v654_v6  ;;  %v692_v34 = vld [vmem:[#allocation2 + $0x30] sm:$0xff] }
 0x2a8   : > { %904 = vadd.xlane.f32.xlu1 %v2587_v36  ;;  %v678_v39 = vmul.f32 %v673_v37, %v673_v37  ;;  %v708_v40 = vpack.c.bf16 %v673_v37, %v672_v31  ;;  %v896_v42 = vsub.f32 %v578_v13, %v892_v35  ;;  %v694_v31 = vld [vmem:[#allocation2 + $0x58] sm:$0xff] }
 0x2a9   : > { %v2050_v43 = vpop.eup %2049  ;;  %v889_v44 = vpop.xlane.xlu1 %888  ;;  %v679_v45 = vmul.f32 %v674_v38, %v674_v38 }
 0x2aa   : > { %v893_v46 = vmul.f32 0.0078125, %v889_v44  ;;  %712 = vxpose.xlu0.c.b16.start [1/2] (short) %v708_v40, 128  ;;  %v681_v47 = vadd.f32 %v678_v39, %v677_v41  ;;  %v900_v48 = vmul.f32 %v896_v42, %v896_v42  ;;  %v675_v49 = vmul.f32 %v2050_v43, %v655_v10  ;;  %v693_v42 = vld [vmem:[#allocation2] sm:$0xff] }
 0x2ac   : > { %906 = vadd.xlane.f32.xlu1 %v900_v48  ;;  %v680_v50 = vmul.f32 %v675_v49, %v675_v49  ;;  %v709_v51 = vpack.c.bf16 %v675_v49, %v674_v38  ;;  %v682_v52 = vadd.f32 %v681_v47, %v679_v45  ;;  %v897_v53 = vsub.f32 %v582_v14, %v893_v46  ;;  %v695_v38 = vld [vmem:[#allocation2 + $0x18] sm:$0xff]  ;;  %v698_v46 = vld [vmem:[#allocation2 + $0x8] sm:$0xff] }
 0x2ae   : > { %713 = vxpose.xlu0.c.b16.end [2/2] (short) %v709_v51, 128  ;;  %v683_v54 = vadd.f32 %v682_v52, %v680_v50  ;;  %v901_v55 = vmul.f32 %v897_v53, %v897_v53  ;;  %v696_v50 = vld [vmem:[#allocation2 + $0x50] sm:$0xff]  ;;  %v699_v53 = vld [vmem:[#allocation2 + $0x48] sm:$0xff] }
 0x2b0   : > { %v684_v56 = vrot.slane %v683_v54, 4  ;;  %908 = vadd.xlane.f32.xlu1 %v901_v55 }
 0x2b2   : > { %v685_v57 = vadd.f32 %v684_v56, %v683_v54 }
 0x2b4   : > { %v686_v58 = vrot.slane %v685_v57, 2 }
 0x2b6   : > { %v687_v59 = vadd.f32 %v686_v58, %v685_v57  ;;  %v697_v57 = vld [vmem:[#allocation2 + $0x68] sm:$0xff] }
 0x2b8   : > { %v688_v60 = vrot.slane %v687_v59, 1 }
 0x2ba   : > { %v689_v62 = vadd.f32 %v688_v60, %v687_v59 }
 0x2bc   : > { %v690_v63 = vadd.f32 %v689_v62, %v676_v61  ;;  %v702_v61 = vld [vmem:[#allocation2 + $0x10] sm:$0xff] }
 0x2be   : > { %691 = vst [vmem:[#allocation3] sm:$0x1] %v690_v63 }
 0x30c   : > { %v720_v0 = vpop.trf.xlu0 }
 0x30d   : > { %1802 = vmatprep.mubr.msk.bf16.mxu0 %vm728_vm0, %v720_v0 }
 0x310   : > { %v721_v1 = vpop.trf.xlu0 }
 0x311   : > { %1803 = vmatmul.mubr.msk.bf16.vlgmr.msra.gmra.mxu0 %vm728_vm0, %v721_v1 }
 0x314   : > { %v722_v2 = vpop.trf.xlu0 }
 0x315   : > { %1806 = vmatprep.mubr.msk.bf16.mxu1 %vm728_vm0, %v722_v2  ;;  %v700_v2 = vld [vmem:[#allocation2 + $0x40] sm:$0xff] }
 0x318   : > { %v723_v3 = vpop.trf.xlu0 }
 0x319   : > { %1807 = vmatmul.mubr.msk.bf16.vlgmr.msra.gmra.mxu1 %vm728_vm0, %v723_v3 }
 0x31c   : > { %v724_v4 = vpop.trf.xlu0 }
 0x31d   : > { %1810 = vmatprep.mubr.msk.bf16.mxu1 %vm728_vm0, %v724_v4 }
 0x320   : > { %v725_v5 = vpop.trf.xlu0 }
 0x321   : > { %1811 = vmatmul.mubr.msk.bf16.gmra.mxu1 %vm728_vm0, %v725_v5 }
 0x324   : > { %v726_v6 = vpop.trf.xlu0 }
 0x325   : > { %1814 = vmatprep.mubr.msk.bf16.mxu1 %vm728_vm0, %v726_v6  ;;  %v703_v6 = vld [vmem:[#allocation2 + $0x38] sm:$0xff] }
 0x328   : > { %v727_v7 = vpop.trf.xlu0 }
 0x329   : > { %1815 = vmatmul.mubr.msk.bf16.gmra.mxu1 %vm728_vm0, %v727_v7 }
 0x32d   : > { %v903_v8 = vpop.xlane.xlu1 %902 }
 0x32e   : > { %v910_v9 = vadd.f32 1e-07, %v903_v8 }
 0x330   : > { %2051 = vrcp.f32 %v910_v9 }
 0x331   : > { %v905_v10 = vpop.xlane.xlu1 %904 }
 0x332   : > { %v911_v11 = vadd.f32 1e-07, %v905_v10  ;;  %v701_v10 = vld [vmem:[#allocation2 + $0x20] sm:$0xff] }
 0x334   : > { %2053 = vrcp.f32 %v911_v11 }
 0x335   : > { %v907_v12 = vpop.xlane.xlu1 %906 }
 0x336   : > { %v912_v13 = vadd.f32 1e-07, %v907_v12 }
 0x338   : > { %2055 = vrcp.f32 %v912_v13 }
 0x339   : > { %v909_v14 = vpop.xlane.xlu1 %908 }
 0x33a   : > { %v913_v15 = vadd.f32 1e-07, %v909_v14  ;;  %v706_v14 = vld [vmem:[#allocation2 + $0x78] sm:$0xff] }
 0x33c   : > { %2057 = vrcp.f32 %v913_v15 }
 0x33d   : > { %v2052_v16 = vpop.eup %2051 }
 0x33e   : > { %v918_v17 = vmul.f32 %v2052_v16, %v2584_v29 }
 0x340   : > { %v922_v18 = vmul.f32 %v918_v17, %v918_v17 }
 0x341   : > { %v2054_v19 = vpop.eup %2053 }
 0x342   : > { %926 = vadd.xlane.f32.xlu1 %v922_v18  ;;  %v919_v20 = vmul.f32 %v2054_v19, %v2587_v36  ;;  %v704_v19 = vld [vmem:[#allocation2 + $0x60] sm:$0xff] }
 0x344   : > { %v923_v21 = vmul.f32 %v919_v20, %v919_v20 }
 0x345   : > { %v2056_v22 = vpop.eup %2055 }
 0x346   : > { %928 = vadd.xlane.f32.xlu1 %v923_v21  ;;  %v2600_v23 = vmul.f32 %v2056_v22, %v900_v48 }
 0x348   : > { %v924_v24 = vmul.f32 %v2600_v23, %v2600_v23 }
 0x349   : > { %v2058_v25 = vpop.eup %2057 }
 0x34a   : > { %930 = vadd.xlane.f32.xlu1 %v924_v24  ;;  %v2604_v26 = vmul.f32 %v2058_v25, %v901_v55  ;;  %v707_v24 = vld [vmem:[#allocation2 + $0x28] sm:$0xff] }
 0x34c   : > { %v925_v27 = vmul.f32 %v2604_v26, %v2604_v26 }
 0x34e   : > { %932 = vadd.xlane.f32.xlu1 %v925_v27 }
 0x3cb   : > { %v927_v28 = vpop.xlane.xlu1 %926 }
 0x3cc   : > { %v934_v29 = vmax.f32 %v927_v28, 1e-24  ;;  %v705_v28 = vld [vmem:[#allocation2 + $0x70] sm:$0xff] }
 0x3ce   : > { %2059 = vrsqrt.f32 %v934_v29 }
 0x3cf   : > { %v929_v30 = vpop.xlane.xlu1 %928 }
 0x3d0   : > { %v935_v32 = vmax.f32 %v929_v30, 1e-24 }
 0x3d1   : > { %v1804_v33 = vpop.f32.mrf.mxu0 }
 0x3d2   : > { %2061 = vrsqrt.f32 %v935_v32  ;;  %v852_v35 = vadd.f32 %v1804_v33, %v694_v31 }
 0x3d3   : > { %v787_v36 = vpop.f32.mrf.mxu0  ;;  %v931_v37 = vpop.xlane.xlu1 %930 }
 0x3d4   : > { %868 = vst [vmem:[#allocation2 + $0x58] sm:$0xff] %v852_v35  ;;  %v850_v39 = vadd.f32 %v787_v36, %v692_v34  ;;  %v936_v40 = vmax.f32 %v931_v37, 1e-24 }
 0x3d5   : > { %v1805_v41 = vpop.f32.mrf.mxu0 }
 0x3d6   : > { %866 = vst [vmem:[#allocation2 + $0x30] sm:$0xff] %v850_v39  ;;  %v853_v43 = vadd.f32 %v1805_v41, %v695_v38  ;;  %2063 = vrsqrt.f32 %v936_v40 }
 0x3d7   : > { %v790_v44 = vpop.f32.mrf.mxu0  ;;  %v933_v45 = vpop.xlane.xlu1 %932 }
 0x3d8   : > { %869 = vst [vmem:[#allocation2 + $0x18] sm:$0xff] %v853_v43  ;;  %v851_v47 = vadd.f32 %v790_v44, %v693_v42  ;;  %v937_v48 = vmax.f32 %v933_v45, 1e-24 }
 0x3d9   : > { %v1808_v49 = vpop.f32.mrf.mxu1 }
 0x3da   : > { %867 = vst [vmem:[#allocation2] sm:$0xff] %v851_v47  ;;  %2065 = vrsqrt.f32 %v937_v48  ;;  %v856_v51 = vadd.f32 %v1808_v49, %v698_v46 }
 0x3db   : > { %v803_v52 = vpop.f32.mrf.mxu1  ;;  %v2060_v55 = vpop.eup %2059 }
 0x3dc   : > { %872 = vst [vmem:[#allocation2 + $0x8] sm:$0xff] %v856_v51  ;;  %v854_v54 = vadd.f32 %v803_v52, %v696_v50  ;;  %v942_v62 = vmul.f32 %v2060_v55, %v918_v17 }
 0x3dd   : > { %v1809_v56 = vpop.f32.mrf.mxu1 }
 0x3de   : > { %870 = vst [vmem:[#allocation2 + $0x50] sm:$0xff] %v854_v54  ;;  %v857_v58 = vadd.f32 %v1809_v56, %v699_v53 }
 0x3df   : > { %v2062_v59 = vpop.eup %2061  ;;  %v806_v60 = vpop.f32.mrf.mxu1 }
 0x3e0   : > { %v943_v63 = vmul.f32 %v2062_v59, %v919_v20  ;;  %873 = vst [vmem:[#allocation2 + $0x48] sm:$0xff] %v857_v58  ;;  %v855_v0 = vadd.f32 %v806_v60, %v697_v57 }
 0x3e1   : > { %v1812_v1 = vpop.f32.mrf.mxu1 }
 0x3e2   : > { %v1654_v3 = vpack.c.bf16 %v943_v63, %v942_v62  ;;  %871 = vst [vmem:[#allocation2 + $0x68] sm:$0xff] %v855_v0  ;;  %v860_v4 = vadd.f32 %v1812_v1, %v702_v61 }
 0x3e3   : > { %v819_v5 = vpop.f32.mrf.mxu1  ;;  %v2064_v8 = vpop.eup %2063 }
 0x3e4   : > { %1655 = vst [vmem:[%s966_s21] sm:$0xff] %v1654_v3   ;;  %876 = vst [vmem:[#allocation2 + $0x10] sm:$0xff] %v860_v4  ;;  %v858_v7 = vadd.f32 %v819_v5, %v700_v2  ;;  %v944_v15 = vmul.f32 %v2064_v8, %v2600_v23 }
 0x3e5   : > { %v1813_v9 = vpop.f32.mrf.mxu1 }
 0x3e6   : > { %874 = vst [vmem:[#allocation2 + $0x40] sm:$0xff] %v858_v7  ;;  %v861_v11 = vadd.f32 %v1813_v9, %v703_v6 }
 0x3e7   : > { %v2066_v12 = vpop.eup %2065  ;;  %v822_v13 = vpop.f32.mrf.mxu1 }
 0x3e8   : > { %v945_v16 = vmul.f32 %v2066_v12, %v2604_v26  ;;  %877 = vst [vmem:[#allocation2 + $0x38] sm:$0xff] %v861_v11  ;;  %v859_v17 = vadd.f32 %v822_v13, %v701_v10 }
 0x3e9   : > { %v1816_v18 = vpop.f32.mrf.mxu1 }
 0x3ea   : > { %v1659_v20 = vpack.c.bf16 %v945_v16, %v944_v15  ;;  %875 = vst [vmem:[#allocation2 + $0x20] sm:$0xff] %v859_v17  ;;  %v864_v21 = vadd.f32 %v1816_v18, %v706_v14 }
 0x3eb   : > { %v835_v22 = vpop.f32.mrf.mxu1 }
 0x3ec   : > { %1727 = vst [vmem:[%s966_s21 + $0x8] sm:$0xff] %v1659_v20   ;;  %880 = vst [vmem:[#allocation2 + $0x78] sm:$0xff] %v864_v21  ;;  %v862_v25 = vadd.f32 %v835_v22, %v704_v19 }
 0x3ed   : > { %v1817_v27 = vpop.f32.mrf.mxu1 }
 0x3ee   : > { %878 = vst [vmem:[#allocation2 + $0x60] sm:$0xff] %v862_v25  ;;  %v865_v29 = vadd.f32 %v1817_v27, %v707_v24 }
 0x3ef   : > { %v838_v30 = vpop.f32.mrf.mxu1 }
 0x3f0   : > { %881 = vst [vmem:[#allocation2 + $0x28] sm:$0xff] %v865_v29  ;;  %v863_v23 = vadd.f32 %v838_v30, %v705_v28 }
 0x3f2   : > { %879 = vst [vmem:[#allocation2 + $0x70] sm:$0xff] %v863_v23 }
 0x3f3 PF: > { %s2770_s13 = sld [smem:[#allocation20_spill]] }
 0x3f9   : > { %p1582_p4 = scmp.ne.s32.totalorder %s2770_s13, 1 }
 0x3fa   : > { %s2771_s11 = sld [smem:[#allocation19_spill]] (!%p1582_p4) }
 0x3fb   : > { %994 = sbr.rel (%p1582_p4) target bundleno = 1495 (0x5d7), region = 64 }
 0x400   : > { %p1583_p6 = scmp.ne.s32.totalorder %s2771_s11, 0 }
 0x402   : > { %998 = sbr.rel (%p1583_p6) target bundleno = 1056 (0x420), region = 68 }
 0x407   : > { %v999_v26 = vld [vmem:[#allocation2 + $0x30] sm:$0xff]  ;;  %v1000_v31 = vld [vmem:[#allocation2] sm:$0xff]  ;;  %v1001_v32 = vld [vmem:[#allocation2 + $0x58] sm:$0xff] }
 0x408   : > { %v1674_v33 = vpack.c.bf16 %v1000_v31, %v999_v26  ;;  %v1002_v34 = vld [vmem:[#allocation2 + $0x18] sm:$0xff]  ;;  %v1003_v35 = vld [vmem:[#allocation2 + $0x50] sm:$0xff]  ;;  %v1004_v36 = vld [vmem:[#allocation2 + $0x68] sm:$0xff] }
 0x409   : > { %v1679_v37 = vpack.c.bf16 %v1002_v34, %v1001_v32  ;;  %v1684_v38 = vpack.c.bf16 %v1004_v36, %v1003_v35  ;;  %v1005_v39 = vld [vmem:[#allocation2 + $0x8] sm:$0xff]  ;;  %v1007_v41 = vld [vmem:[#allocation2 + $0x40] sm:$0xff]  ;;  %v1009_v44 = vld [vmem:[#allocation2 + $0x10] sm:$0xff] }
 0x40a   : > { %v1006_v40 = vld [vmem:[#allocation2 + $0x48] sm:$0xff]  ;;  %1675 = vst [vmem:[#allocation4] sm:$0xff] %v1674_v33   ;;  %v1008_v43 = vld [vmem:[#allocation2 + $0x20] sm:$0xff]  ;;  %v1010_v45 = vld [vmem:[#allocation2 + $0x38] sm:$0xff] }
 0x40b   : > { %v1689_v42 = vpack.c.bf16 %v1006_v40, %v1005_v39  ;;  %1729 = vst [vmem:[#allocation4 + $0x8] sm:$0xff] %v1679_v37   ;;  %1730 = vst [vmem:[#allocation4 + $0x10] sm:$0xff] %v1684_v38   ;;  %v1694_v46 = vpack.c.bf16 %v1008_v43, %v1007_v41  ;;  %v1699_v47 = vpack.c.bf16 %v1010_v45, %v1009_v44  ;;  %v1011_v48 = vld [vmem:[#allocation2 + $0x60] sm:$0xff]  ;;  %v1012_v49 = vld [vmem:[#allocation2 + $0x70] sm:$0xff] }
 0x40c   : > { %v1013_v50 = vld [vmem:[#allocation2 + $0x78] sm:$0xff]  ;;  %v1704_v51 = vpack.c.bf16 %v1012_v49, %v1011_v48  ;;  %v1014_v52 = vld [vmem:[#allocation2 + $0x28] sm:$0xff]  ;;  %v1095_v53 = vld [vmem:[#allocation3] sm:$0x1] }
 0x40d   : > { %1731 = vst [vmem:[#allocation4 + $0x18] sm:$0xff] %v1689_v42   ;;  %1732 = vst [vmem:[#allocation4 + $0x20] sm:$0xff] %v1694_v46   ;;  %v1709_v54 = vpack.c.bf16 %v1014_v52, %v1013_v50  ;;  %v1096_v55 = vmax.f32 %v1095_v53, 1e-24 }
 0x40e   : > { %1733 = vst [vmem:[#allocation4 + $0x28] sm:$0xff] %v1699_v47   ;;  %1734 = vst [vmem:[#allocation4 + $0x30] sm:$0xff] %v1704_v51  }
 0x40f   : > { %1735 = vst [vmem:[#allocation4 + $0x38] sm:$0xff] %v1709_v54   ;;  %2067 = vrsqrt.f32 %v1096_v55 }
 0x41c   : > { %v2068_v56 = vpop.eup %2067 }
 0x41d   : > { %v1098_v57 = vmul.f32 0.125, %v2068_v56 }
 0x41f   : > { %1099 = vst [vmem:[#allocation3] sm:$0x1] %v1098_v57 }
 0x420 PF: > { %v2069_v58 = vld [vmem:[#allocation4 + $0x38] sm:$0xff]   ;;  %s2772_s6 = sld [smem:[#allocation19_spill]]  ;;  %v2070_v59 = vld [vmem:[#allocation4 + $0x30] sm:$0xff]   ;;  %v2071_v60 = vld [vmem:[#allocation4 + $0x28] sm:$0xff]  }
 0x421   : > { %1818 = vmatprep.subr.bf16.mxu0 %v2069_v58  ;;  %v2072_v61 = vld [vmem:[#allocation4 + $0x20] sm:$0xff]   ;;  %v2077_v2 = vld [vmem:[#allocation12 + $0x38] sm:$0xff]   ;;  %v2078_v3 = vld [vmem:[#allocation12 + $0x30] sm:$0xff]   ;;  %s2773_s5 = sld [smem:[#allocation31_spill]] }
 0x422   : > { %1819 = vmatpush3.bf16.msra.mxu0 %v2069_v58  ;;  %v2073_v6 = vld [vmem:[#allocation4 + $0x18] sm:$0xff]   ;;  %1838 = vmatprep.subr.bf16.mxu1 %v2077_v2  ;;  %v2079_v8 = vld [vmem:[#allocation12 + $0x28] sm:$0xff]   ;;  %v2074_v9 = vld [vmem:[#allocation4 + $0x10] sm:$0xff]  }
 0x423   : > { %1820 = vmatprep.subr.bf16.mxu0 %v2070_v59  ;;  %1839 = vmatpush3.bf16.msra.mxu1 %v2077_v2  ;;  %v2080_v10 = vld [vmem:[#allocation12 + $0x20] sm:$0xff]   ;;  %v2075_v12 = vld [vmem:[#allocation4 + $0x8] sm:$0xff]   ;;  %v2081_v15 = vld [vmem:[#allocation12 + $0x18] sm:$0xff]  }
 0x424   : > { %1840 = vmatprep.subr.bf16.mxu1 %v2078_v3  ;;  %v2076_v16 = vld [vmem:[#allocation4] sm:$0xff]   ;;  %v2082_v20 = vld [vmem:[#allocation12 + $0x10] sm:$0xff]   ;;  %v2083_v21 = vld [vmem:[#allocation12 + $0x8] sm:$0xff]  }
 0x425   : > { %v2084_v22 = vld [vmem:[#allocation12] sm:$0xff]  }
 0x426   : > { %s1600_s15 = sshll.u32 %s2772_s6, 5  ;;  %1821 = vmatpush3.bf16.msra.mxu0 %v2070_v59  ;;  %v1603_v63 = vld [vmem:[#allocation3] ss:$0 sm:$0xff] }
 0x427   : > { %s2615_s1 = sshra.s32 %s1600_s15, 3  ;;  %1822 = vmatprep.subr.bf16.mxu0 %v2071_v60  ;;  %1841 = vmatpush3.bf16.msra.mxu1 %v2078_v3  ;;  %v1612_v39 = vld [vmem:[%s2773_s5] ss:$0 sm:$0xff] }
 0x428   : > { %s1601_s14 = sshll.u32 %s2615_s1, 2  ;;  %1842 = vmatprep.subr.bf16.mxu1 %v2079_v8 }
 0x429   : > { %s1104_s3 = scalar_lea.vmem [#allocation5], %s1601_s14  ;;  %s1114_s12 = scalar_lea.vmem [#allocation6], %s1601_s14 }
 0x42a   : > { %v1712_v62 = vld [vmem:[%s1104_s3] sm:$0xff]   ;;  %1823 = vmatpush3.bf16.msra.mxu0 %v2071_v60  ;;  %v1736_v11 = vld [vmem:[%s1104_s3 + $0x8] sm:$0xff]  }
 0x42b   : > { %v1713_v0 = vunpack.c.l.bf16 %v1712_v62  ;;  %v1714_v1 = vunpack.c.h.bf16 %v1712_v62  ;;  %1824 = vmatprep.subr.bf16.mxu0 %v2072_v61  ;;  %1843 = vmatpush3.bf16.msra.mxu1 %v2079_v8  ;;  %v1717_v13 = vunpack.c.l.bf16 %v1736_v11  ;;  %v1718_v14 = vunpack.c.h.bf16 %v1736_v11  ;;  %v1720_v25 = vld [vmem:[%s1114_s12] sm:$0xff]   ;;  %v1737_v27 = vld [vmem:[%s1114_s12 + $0x8] sm:$0xff]  }
 0x42c   : > { %1844 = vmatprep.subr.bf16.mxu1 %v2080_v10  ;;  %v1726_v29 = vunpack.c.h.bf16 %v1737_v27  ;;  %v1721_v30 = vunpack.c.l.bf16 %v1720_v25  ;;  %v1722_v23 = vunpack.c.h.bf16 %v1720_v25  ;;  %v1725_v26 = vunpack.c.l.bf16 %v1737_v27 }
 0x42d   : > { %v1130_v4 = vmul.f32 %v1713_v0, %v1603_v63  ;;  %v1131_v5 = vmul.f32 %v1714_v1, %v1603_v63  ;;  %v1132_v17 = vmul.f32 %v1717_v13, %v1603_v63  ;;  %v1133_v18 = vmul.f32 %v1718_v14, %v1603_v63 }
 0x42e   : > { %1825 = vmatpush3.bf16.msra.mxu0 %v2072_v61 }
 0x42f   : > { %v1134_v7 = vpack.c.bf16 %v1131_v5, %v1130_v4  ;;  %1826 = vmatprep.subr.bf16.mxu0 %v2073_v6  ;;  %1845 = vmatpush3.bf16.msra.mxu1 %v2080_v10  ;;  %v1135_v19 = vpack.c.bf16 %v1133_v18, %v1132_v17 }
 0x430   : > { %1846 = vmatprep.subr.bf16.mxu1 %v2081_v15 }
 0x431   : > { %1834 = vmatprep.mubr.bf16.mxu0 %v1134_v7 }
 0x432   : > { %1827 = vmatpush3.bf16.msra.mxu0 %v2073_v6 }
 0x433   : > { %1828 = vmatprep.subr.bf16.mxu0 %v2074_v9  ;;  %1847 = vmatpush3.bf16.msra.mxu1 %v2081_v15 }
 0x434   : > { %1848 = vmatprep.subr.bf16.mxu1 %v2082_v20 }
 0x436   : > { %1829 = vmatpush3.bf16.msra.mxu0 %v2074_v9 }
 0x437   : > { %1830 = vmatprep.subr.bf16.mxu0 %v2075_v12  ;;  %1849 = vmatpush3.bf16.msra.mxu1 %v2082_v20 }
 0x438   : > { %1850 = vmatprep.subr.bf16.mxu1 %v2083_v21 }
 0x43a   : > { %1831 = vmatpush3.bf16.msra.mxu0 %v2075_v12 }
 0x43b   : > { %1832 = vmatprep.subr.bf16.mxu0 %v2076_v16  ;;  %1851 = vmatpush3.bf16.msra.mxu1 %v2083_v21 }
 0x43c   : > { %1852 = vmatprep.subr.bf16.mxu1 %v2084_v22 }
 0x43e   : > { %1833 = vmatpush3.bf16.msra.mxu0 %v2076_v16 }
 0x43f   : > { %1853 = vmatpush3.bf16.msra.mxu1 %v2084_v22 }
 0x441   : > { %1835 = vmatmul.mubr.bf16.vlgmr.msra.gmra.mxu0 %v1135_v19 }
 0x501   : > { %v1836_v24 = vpop.f32.mrf.mxu0 }
 0x502   : > { %v1251_v36 = vadd.f32 %v1836_v24, %v1725_v26 }
 0x503   : > { %v1234_v28 = vpop.f32.mrf.mxu0 }
 0x504   : > { %v1249_v34 = vadd.f32 %v1721_v30, %v1234_v28 }
 0x505   : > { %v1837_v31 = vpop.f32.mrf.mxu0 }
 0x506   : > { %v1252_v32 = vadd.f32 %v1837_v31, %v1726_v29 }
 0x507   : > { %v1237_v33 = vpop.f32.mrf.mxu0 }
 0x508   : > { %v1250_v35 = vadd.f32 %v1722_v23, %v1237_v33  ;;  %v1254_v38 = vpack.c.bf16 %v1252_v32, %v1251_v36 }
 0x50a   : > { %v1253_v37 = vpack.c.bf16 %v1250_v35, %v1249_v34 }
 0x50c   : > { %1854 = vmatprep.mubr.bf16.mxu1 %v1253_v37 }
 0x50d   : > { %1855 = vmatmul.mubr.bf16.vlgmr.msra.gmra.mxu1 %v1254_v38 }
 0x5cd   : > { %v1856_v40 = vpop.f32.mrf.mxu1 }
 0x5ce   : > { %v1369_v41 = vadd.f32 %v1856_v40, %v1612_v39 }
 0x5cf   : > { %v1360_v42 = vpop.f32.mrf.mxu1 }
 0x5d0   : > { %1377 = vst [vmem:[%s2562_s4 + $0x10] sm:$0xff] %v1369_v41  ;;  %v1361_v43 = vadd.f32 %v1612_v39, %v1360_v42 }
 0x5d1   : > { %v1857_v44 = vpop.f32.mrf.mxu1 }
 0x5d2   : > { %1375 = vst [vmem:[%s2562_s4] sm:$0xff] %v1361_v43  ;;  %v1372_v45 = vadd.f32 %v1857_v44, %v1612_v39 }
 0x5d3   : > { %v1363_v46 = vpop.f32.mrf.mxu1 }
 0x5d4   : > { %1378 = vst [vmem:[%s2562_s4 + $0x18] sm:$0xff] %v1372_v45  ;;  %v1364_v47 = vadd.f32 %v1612_v39, %v1363_v46 }
 0x5d6   : > { %1376 = vst [vmem:[%s2562_s4 + $0x8] sm:$0xff] %v1364_v47 }
 0x5d7 PF: > { %s2774_s8 = sld [smem:[#allocation20_spill]]  ;;  %s1396_s27 = sshll.u32 %s2562_s4, 4  ;;  %s2633_s27 = int_to_ptr.vmem [resolvable:$true] %s1396_s27 }
 0x5d8   : > { %s2775_s9 = sld [smem:[#allocation19_spill]]  ;;  %s2642_s3 = scalar_lea.sflag [#allocation9], %s305_s16 }
 0x5d9   : > { %s2776_s18 = sld [smem:[#allocation21_spill]]  ;;  %s2165_s12 = scalar_lea.vmem %s2633_s27, 512 }
 0x5da   : > { %s2778_s24 = sld [smem:[#allocation24_spill]]  ;;  %p2166_p10 = scmp.ne.s32.totalorder %s2633_s27, %s2165_s12 }
 0x5db   : > { %s2779_s1 = sld [smem:[#allocation32_spill]]  ;;  %s2316_s4 = smov [#allocation13]  }
 0x5dc   : > { %s2169_s26 = sshll.u32 %s2316_s4, 4  ;;  %s2170_s26 = int_to_ptr.vmem [resolvable:$false] %s2169_s26 }
 0x5dd   : > { %s2171_s2 = scalar_lea.vmem %s2170_s26, 1024  ;;  %p2172_p9 = scmp.lt.s32.totalorder %s2633_s27, %s2170_s26 }
 0x5de   : > { %s1387_s25 = smul.u32 %s2775_s9, %s2774_s8  ;;  %p2173_p12 = scmp.lt.s32.totalorder %s2171_s2, %s2165_s12 }
 0x5df   : > { %s1623_s10 = sshll.u32 %s2776_s18, 3 }
 0x5e0   : > { %s1622_s21 = sshll.u32 %s1387_s25, 2  ;;  %p2780_p13 = scmp.ne.s32.totalorder %s2778_s24, 0 }
 0x5e1   : > { %s1393_s13 = sadd.s32 %s1623_s10, %s1622_s21  ;;  %p2174_p2 = por %p2173_p12, %p2172_p9 }
 0x5e2   : > { %s1624_s11 = sshll.u32 %s1393_s13, 7  ;;  %p2167_p0 = pnand %p2166_p10, %p2780_p13 }
 0x5e3   : > { %s2638_s14 = scalar_lea.hbm %s2779_s1, %s1624_s11 }
 0x5e4   : > { %p2168_p8 = pneg %p2167_p0 }
 0x5e6   : > { %p2175_p7 = pnand %p2174_p2, %p2168_p8 }
 0x5e8   : > { %2178 = shalt.err (!%p2175_p7)
}
 0x5e9   : > { %s2179_s16 = scalar_lea.hbm %s2638_s14, 512  ;;  %s2183_s9 = scalar_lea.hbm %s2779_s1, 2048 }
 0x5ea   : > { %p2180_p1 = scmp.ne.s32.totalorder %s2638_s14, %s2179_s16  ;;  %p2184_p3 = scmp.lt.s32.totalorder %s2638_s14, %s2779_s1 }
 0x5eb   : > { %p2185_p4 = scmp.lt.s32.totalorder %s2183_s9, %s2179_s16 }
 0x5ec   : > { %p2181_p5 = pnand %p2180_p1, %p2780_p13 }
 0x5ed   : > { %p2186_p6 = por %p2185_p4, %p2184_p3 }
 0x5ee   : > { %p2182_p11 = pneg %p2181_p5 }
 0x5f0   : > { %p2187_p10 = pnand %p2186_p6, %p2182_p11 }
 0x5f2   : > { %2190 = shalt.err (!%p2187_p10)
}
 0x5f3   : > { %s2317_s25 = smov 128   ;;  %s2318_s10 = smov 8  }
 0x5f4   : > { %1872 = dma.vmem_to_hbm [thread:$0]  (%p2780_p13), %s2633_s27, 512, %s2638_s14, %s2642_s3, %s2317_s25, %s2317_s25, %s2318_s10  }
 0x5f5 PF: > { %s2781_s21 = sld [smem:[#allocation17_spill]]  ;;  %p1894_p0 = scmp.ge.s32.totalorder %s2305_s30, 2 }
 0x5f6   : > { %s2782_s13 = sld [smem:[#allocation25_spill]] }
 0x5fb   : > { %s1411_s11 = sand.u32 1, %s2781_s21  }
 0x5fc   : > { %p2783_p8 = scmp.ne.s32.totalorder %s2782_s13, 0  ;;  %s1412_s6 = scalar_lea.sflag [#allocation9], %s1411_s11 }
 0x5fe   : > { %p1886_p9 = pnand %p1894_p0, %p2783_p8 }
 0x600   : > { %p1887_p12 = pneg %p1886_p9 }
 0x602   : > { %2252 = dma.done.wait (%p1887_p12), %s1412_s6, 512  }
 0x603   : > { %2254 = vsyncadd (%p1887_p12), %s1412_s6, 4294966784  ;;  %s22_s30 = sadd.s32 1, %s2305_s30   ;;  %s2785_s18 = sld [smem:[#allocation18_spill]] }
 0x604   : > { %p2670_p2 = scmp.ge.s32.totalorder %s22_s30, 10   ;;  %s2786_s24 = sld [smem:[#allocation22_spill]] }
 0x605   : > { %s2787_s25 = sld [smem:[#allocation23_spill]]  ;;  %s2790_s19 = smov %s2265_s20 }
 0x606   : > { %s2788_s14 = sld [smem:[#allocation26_spill]]  ;;  %s2791_s20 = smov %s2509_s28 }
 0x607   : > { %s2789_s3 = sld [smem:[#allocation27_spill]]  ;;  %s2792_s21 = smov %s2273_s22 }
 0x608   : > { %s2793_s22 = smov %s2277_s23  ;;  %s2794_s23 = smov %s2506_s17 }
 0x609   : > { %s2795_s26 = smov %s2301_s29  ;;  %s2796_s27 = smov %s2800_s7 }
 0x60a   :  { %21 = sbr.rel (!%p2670_p2) target bundleno = 17 (0x11), region = 113 }
 0x60c   : > { %s2797_s28 = smov %s2788_s14 }
 0x60d   : > { %s2798_s29 = smov %s2789_s3 }
 0x60f   :  { %1417 = vsyncpa [#allocation8], 1 }
 0x610   :  { %1419 = vsyncpa [#allocation8 + $0x1], 1 }
 0x611   :  { %1420 = vsyncpa [#allocation11], 1 }
 0x612   :  { %1421 = vsyncpa [#allocation9], 1 }
 0x613   :  { %1423 = vsyncpa [#allocation9 + $0x1], 1 }

</bundles_post_ra>
